<compile_context>
chip_gen: v7x
topology: tpu7x:2x2x1
jax: 0.10.0
libtpu: 0.0.40
codegen_flags: <defaults>
</compile_context>

<pallas_src>
import functools

import jax
import jax.numpy as jnp
from jax import lax
from jax.experimental import pallas as pl
from jax.experimental.pallas import tpu as pltpu


def _mish(x):
    # mish(x) = x * tanh(softplus(x)) = x * (e^2 + 2e) / (e^2 + 2e + 2), e = exp(x),
    # evaluated with n = exp(-|x|) (branch-stable, single EUP exp) and an
    # approximate EUP reciprocal refined by one Newton step.
    n = jnp.exp(-jnp.abs(x))
    n2 = n * n
    num = jnp.where(x >= 0, 1.0 + 2.0 * n, n2 + 2.0 * n)
    den = num + jnp.where(x >= 0, 2.0 * n2, 2.0)          # den is in [1, 5]
    r = pl.reciprocal(den, approx=True)
    r = r * (2.0 - den * r)                               # one Newton refinement
    return x * num * r


def _sigmoid(z):
    # stable sigmoid via tanh (no overflowing exp); only used on the tiny SE gate
    return 0.5 * (jnp.tanh(0.5 * z) + 1.0)


def _residual_block_kernel(
    x_ref,      # (NB, C, HW)        unpadded flattened input block (also the residual)
    w1_ref,     # (C, K*K*C)         conv1 weight, BN1 folded, im2col layout (kh, kw, cin)
    b1_ref,     # (C, 1)             BN1 folded bias
    w2_ref,     # (C, K*K*C)         conv2 weight, BN2 folded
    b2_ref,     # (C, 1)             BN2 folded bias
    cmask_ref,  # (K, HW)            per-kw column-validity mask (kills row wrap of the shift trick)
    sew1_ref,   # (S, C)             SE fc1 weight
    sew2_ref,   # (C, S)             SE fc2 weight
    o_ref,      # (NB, C, HW)
    xs_ref,     # VMEM scratch (NB, C, HW + 2*m_s): zero-margined staged input
    a1s_ref,    # VMEM scratch (NB, C, HW + 2*m_s): zero-margined conv1 activation
    *, ksize, hw, m_in, m_s, pad, w_dim, inv_hw, nb,
):
    c = o_ref.shape[1]

    # Zero only the margin columns the shifted windows actually read.  The
    # centers are fully overwritten below, so nothing else needs initializing.
    zeros_margin = jnp.zeros((nb, c, m_in), jnp.float32)
    xs_ref[:, :, m_s - m_in:m_s] = zeros_margin
    xs_ref[:, :, m_s + hw:m_s + hw + m_in] = zeros_margin
    a1s_ref[:, :, m_s - m_in:m_s] = zeros_margin
    a1s_ref[:, :, m_s + hw:m_s + hw + m_in] = zeros_margin

    # In-kernel zero padding: stage the input block into the margined scratch
    # (lane-aligned center store; m_s is a multiple of 128).
    xs_ref[:, :, m_s:m_s + hw] = x_ref[...]

    # Hoist column-mask broadcasts; the center column (kw == pad) needs no mask.
    masks = [None] * ksize
    for kw in range(ksize):
        if kw != pad:
            masks[kw] = jnp.broadcast_to(cmask_ref[kw:kw + 1, :], (c, hw))

    # Load the small resident operands once.
    w1 = w1_ref[...]
    w2 = w2_ref[...]
    b1 = b1_ref[...]
    b2 = b2_ref[...]
    sew1 = sew1_ref[...]
    sew2 = sew2_ref[...]

    def im2col(src_ref, b):
        # Stack the K*K shifted (masked) windows along sublanes -> (K*K*C, HW).
        # The zero margin provides top/bottom padding; the column mask zeroes
        # row-wrapped lanes.  Conv then becomes a single MXU matmul.
        cols = []
        for kh in range(ksize):
            for kw in range(ksize):
                shift = (kh - pad) * w_dim + (kw - pad)            # static
                win = src_ref[b, :, m_s + shift:m_s + shift + hw]  # (C, HW)
                if kw != pad:
                    win = win * masks[kw]
                cols.append(win)
        return jnp.concatenate(cols, axis=0)                       # (K*K*C, HW)

    for b in range(nb):                                            # static, unrolled
        # ---- conv1 + folded BN1 + Mish -> zero-margined VMEM scratch ----
        a1 = _mish(jnp.dot(w1, im2col(xs_ref, b),
                           preferred_element_type=jnp.float32) + b1)
        a1s_ref[b, :, m_s:m_s + hw] = a1

        # ---- conv2 + folded BN2 (kept live in vregs; no scratch round-trip) ----
        a2 = jnp.dot(w2, im2col(a1s_ref, b),
                     preferred_element_type=jnp.float32) + b2      # (C, HW)

        # ---- squeeze-and-excitation gate (tiny matmuls) ----
        pooled = jnp.sum(a2, axis=-1, keepdims=True) * inv_hw                     # (C, 1)
        hvec = _mish(jnp.dot(sew1, pooled, preferred_element_type=jnp.float32))   # (S, 1)
        gate = _sigmoid(jnp.dot(sew2, hvec, preferred_element_type=jnp.float32))  # (C, 1)

        # ---- rescale + residual add + final Mish ----
        o_ref[b] = _mish(a2 * gate + x_ref[b]).astype(o_ref.dtype)


def residual_block(x, params):
    """x: (N, C, H, W) f32. Returns mish(se(bn2(conv2(mish(bn1(conv1(x)))))) + x)."""
    n, c, h, w = x.shape
    conv1_w = params["conv1_w"]                      # (C, C, K, K)
    k = conv1_w.shape[-1]
    pad = (k - 1) // 2                               # 'same' padding, stride 1
    hw = h * w
    m_in = pad * (w + 1)                             # margin actually read by shifted windows
    m_s = ((m_in + 127) // 128) * 128                # lane-aligned scratch margin

    # Batch blocking: largest divisor of n that is <= 8 samples per grid step.
    nb = 1
    for cand in range(min(n, 8), 0, -1):
        if n % cand == 0:
            nb = cand
            break

    def fold_bn(conv_w, gamma, beta, mean, var, eps=1e-5):
        scale = gamma * lax.rsqrt(var + eps)                         # (C,)
        w_eff = conv_w * scale[:, None, None, None]                  # (Cout, Cin, K, K)
        b_eff = beta - mean * scale                                  # (C,)
        # im2col layout (Cout, K*K*Cin), columns ordered (kh, kw, cin) to match
        # the in-kernel window stacking order.
        w_flat = jnp.transpose(w_eff, (0, 2, 3, 1)).reshape(c, k * k * c)
        return w_flat, b_eff[:, None]

    w1_flat, b1 = fold_bn(conv1_w, params["bn1_gamma"], params["bn1_beta"],
                          params["bn1_mean"], params["bn1_var"])
    w2_flat, b2 = fold_bn(params["conv2_w"], params["bn2_gamma"], params["bn2_beta"],
                          params["bn2_mean"], params["bn2_var"])

    # Column-validity mask: for tap column kw, output column j is valid iff
    # 0 <= j + (kw - pad) < W.
    j = jnp.arange(w)
    cmask = jnp.stack([
        jnp.tile(((j + (kw - pad) >= 0) & (j + (kw - pad) < w)).astype(x.dtype), h)
        for kw in range(k)
    ])                                                               # (K, HW)

    x_flat = x.reshape(n, c, hw)                                     # no host-side padding
    s = params["se_w1"].shape[0]

    kernel = functools.partial(
        _residual_block_kernel,
        ksize=k, hw=hw, m_in=m_in, m_s=m_s, pad=pad, w_dim=w, inv_hw=1.0 / hw, nb=nb)

    out_flat = pl.pallas_call(
        kernel,
        out_shape=jax.ShapeDtypeStruct((n, c, hw), x.dtype),
        grid=(n // nb,),
        in_specs=[
            pl.BlockSpec((nb, c, hw), lambda i: (i, 0, 0)),
            pl.BlockSpec((c, k * k * c), lambda i: (0, 0)),
            pl.BlockSpec((c, 1), lambda i: (0, 0)),
            pl.BlockSpec((c, k * k * c), lambda i: (0, 0)),
            pl.BlockSpec((c, 1), lambda i: (0, 0)),
            pl.BlockSpec((k, hw), lambda i: (0, 0)),
            pl.BlockSpec((s, c), lambda i: (0, 0)),
            pl.BlockSpec((c, s), lambda i: (0, 0)),
        ],
        out_specs=pl.BlockSpec((nb, c, hw), lambda i: (i, 0, 0)),
        scratch_shapes=[
            pltpu.VMEM((nb, c, hw + 2 * m_s), jnp.float32),   # zero-margined staged input
            pltpu.VMEM((nb, c, hw + 2 * m_s), jnp.float32),   # zero-margined conv1 activation
        ],
        compiler_params=pltpu.CompilerParams(
            dimension_semantics=("parallel",),                # shard batch blocks across cores
            vmem_limit_bytes=32 * 1024 * 1024,
        ),
    )(x_flat, w1_flat, b1, w2_flat, b2, cmask, params["se_w1"], params["se_w2"])

    return out_flat.reshape(n, c, h, w)


def _reference(x, p):
    """Pure-JAX reference mirroring the PyTorch ResidualBlock (BN in eval mode)."""
    eps = 1e-5
    k = p["conv1_w"].shape[-1]
    pad = (k - 1) // 2

    def conv_bn(inp, wgt, gamma, beta, mean, var):
        y = lax.conv_general_dilated(
            inp, wgt, window_strides=(1, 1),
            padding=((pad, pad), (pad, pad)),
            dimension_numbers=("NCHW", "OIHW", "NCHW"),
            precision=lax.Precision.HIGHEST)
        scale = gamma / jnp.sqrt(var + eps)
        return y * scale[None, :, None, None] + (beta - mean * scale)[None, :, None, None]

    def mish(v):
        return v * jnp.tanh(jax.nn.softplus(v))

    a = mish(conv_bn(x, p["conv1_w"], p["bn1_gamma"], p["bn1_beta"],
                     p["bn1_mean"], p["bn1_var"]))
    a = conv_bn(a, p["conv2_w"], p["bn2_gamma"], p["bn2_beta"],
                p["bn2_mean"], p["bn2_var"])
    y = jnp.mean(a, axis=(2, 3))                                              # (N, C)
    y = mish(jnp.matmul(y, p["se_w1"].T, precision=lax.Precision.HIGHEST))
    gate = jax.nn.sigmoid(jnp.matmul(y, p["se_w2"].T, precision=lax.Precision.HIGHEST))
    a = a * gate[:, :, None, None]
    return mish(a + x)


if __name__ == "__main__":
    # Small shapes consistent with the module; HW = 256 is lane-dense (mult. of 128).
    N, C, H, W = 2, 8, 16, 16
    K = 3
    REDUCTION = 4                       # ResidualBlock uses SEBlock(out_channels, reduction=4)
    S = C // REDUCTION                  # squeezed = 2

    key = jax.random.PRNGKey(0)
    ks = jax.random.split(key, 13)
    x = jax.random.normal(ks[0], (N, C, H, W), dtype=jnp.float32)
    params = dict(
        conv1_w=0.1 * jax.random.normal(ks[1], (C, C, K, K), dtype=jnp.float32),
        bn1_gamma=1.0 + 0.1 * jax.random.normal(ks[2], (C,), dtype=jnp.float32),
        bn1_beta=0.1 * jax.random.normal(ks[3], (C,), dtype=jnp.float32),
        bn1_mean=0.1 * jax.random.normal(ks[4], (C,), dtype=jnp.float32),
        bn1_var=0.5 + jax.random.uniform(ks[5], (C,), dtype=jnp.float32),
        conv2_w=0.1 * jax.random.normal(ks[6], (C, C, K, K), dtype=jnp.float32),
        bn2_gamma=1.0 + 0.1 * jax.random.normal(ks[7], (C,), dtype=jnp.float32),
        bn2_beta=0.1 * jax.random.normal(ks[8], (C,), dtype=jnp.float32),
        bn2_mean=0.1 * jax.random.normal(ks[9], (C,), dtype=jnp.float32),
        bn2_var=0.5 + jax.random.uniform(ks[10], (C,), dtype=jnp.float32),
        se_w1=0.3 * jax.random.normal(ks[11], (S, C), dtype=jnp.float32),   # nn.Linear(C, S).weight
        se_w2=0.3 * jax.random.normal(ks[12], (C, S), dtype=jnp.float32),   # nn.Linear(S, C).weight
    )

    fwd = jax.jit(residual_block)
    out = jax.block_until_ready(fwd(x, params))
    ref = _reference(x, params)

    assert out.shape == (N, C, H, W)
    max_err = float(jnp.max(jnp.abs(out - ref)))
    # Tolerance covers possible multi-pass/bf16 MXU emulation of f32 matmuls and the
    # approximate-reciprocal Mish; structural bugs would be O(1e-1+).
    assert jnp.allclose(out, ref, atol=1e-2, rtol=1e-2), f"mismatch vs reference (max abs err {max_err})"
    print("KERNEL_OK")
</pallas_src>

<mosaic_0001>
module attributes {stable_mosaic.version = 11 : i64} {
  func.func @_residual_block_kernel(%arg0: i32, %arg1: memref<2x8x256xf32, #tpu.memory_space<vmem>>, %arg2: memref<8x72xf32, #tpu.memory_space<vmem>>, %arg3: memref<8x1xf32, #tpu.memory_space<vmem>>, %arg4: memref<8x72xf32, #tpu.memory_space<vmem>>, %arg5: memref<8x1xf32, #tpu.memory_space<vmem>>, %arg6: memref<3x256xf32, #tpu.memory_space<vmem>>, %arg7: memref<2x8xf32, #tpu.memory_space<vmem>>, %arg8: memref<8x2xf32, #tpu.memory_space<vmem>>, %arg9: memref<2x8x256xf32, #tpu.memory_space<vmem>>, %arg10: memref<2x8x512xf32, #tpu.memory_space<vmem>>, %arg11: memref<2x8x512xf32, #tpu.memory_space<vmem>>) attributes {dimension_semantics = [#tpu.dimension_semantics<parallel>], iteration_bounds = array<i64: 1>, scalar_prefetch = 0 : i64, scratch_operands = 2 : i64, tpu.core_type = #tpu.core_type<tc>, window_params = [{transform_indices = @transform_0, window_bounds = array<i64: 2, 8, 256>}, {pipeline_mode = #tpu.pipeline_mode<synchronous>, transform_indices = @transform_1, window_bounds = array<i64: 8, 72>}, {pipeline_mode = #tpu.pipeline_mode<synchronous>, transform_indices = @transform_2, window_bounds = array<i64: 8, 1>}, {pipeline_mode = #tpu.pipeline_mode<synchronous>, transform_indices = @transform_3, window_bounds = array<i64: 8, 72>}, {pipeline_mode = #tpu.pipeline_mode<synchronous>, transform_indices = @transform_4, window_bounds = array<i64: 8, 1>}, {pipeline_mode = #tpu.pipeline_mode<synchronous>, transform_indices = @transform_5, window_bounds = array<i64: 3, 256>}, {pipeline_mode = #tpu.pipeline_mode<synchronous>, transform_indices = @transform_6, window_bounds = array<i64: 2, 8>}, {pipeline_mode = #tpu.pipeline_mode<synchronous>, transform_indices = @transform_7, window_bounds = array<i64: 8, 2>}, {transform_indices = @transform_8, window_bounds = array<i64: 2, 8, 256>}]} {
    %cst = arith.constant 0.000000e+00 : f32
    %0 = vector.broadcast %cst : f32 to vector<2x8x17xf32>
    %c0 = arith.constant 0 : index
    %c0_0 = arith.constant 0 : index
    %c111 = arith.constant 111 : index
    %1 = vector.load %arg10[%c0, %c0_0, %c111] : memref<2x8x512xf32, #tpu.memory_space<vmem>>, vector<2x8x17xf32>
    tpu.vector_store %arg10[%c0, %c0_0, %c111], %0 {strides = array<i32>} : memref<2x8x512xf32, #tpu.memory_space<vmem>>, vector<2x8x17xf32>,
    %c0_1 = arith.constant 0 : index
    %c0_2 = arith.constant 0 : index
    %c384 = arith.constant 384 : index
    %2 = vector.load %arg10[%c0_1, %c0_2, %c384] : memref<2x8x512xf32, #tpu.memory_space<vmem>>, vector<2x8x17xf32>
    tpu.vector_store %arg10[%c0_1, %c0_2, %c384], %0 {strides = array<i32>} : memref<2x8x512xf32, #tpu.memory_space<vmem>>, vector<2x8x17xf32>,
    %c0_3 = arith.constant 0 : index
    %c0_4 = arith.constant 0 : index
    %c111_5 = arith.constant 111 : index
    %3 = vector.load %arg11[%c0_3, %c0_4, %c111_5] : memref<2x8x512xf32, #tpu.memory_space<vmem>>, vector<2x8x17xf32>
    tpu.vector_store %arg11[%c0_3, %c0_4, %c111_5], %0 {strides = array<i32>} : memref<2x8x512xf32, #tpu.memory_space<vmem>>, vector<2x8x17xf32>,
    %c0_6 = arith.constant 0 : index
    %c0_7 = arith.constant 0 : index
    %c384_8 = arith.constant 384 : index
    %4 = vector.load %arg11[%c0_6, %c0_7, %c384_8] : memref<2x8x512xf32, #tpu.memory_space<vmem>>, vector<2x8x17xf32>
    tpu.vector_store %arg11[%c0_6, %c0_7, %c384_8], %0 {strides = array<i32>} : memref<2x8x512xf32, #tpu.memory_space<vmem>>, vector<2x8x17xf32>,
    %c0_9 = arith.constant 0 : index
    %c0_10 = arith.constant 0 : index
    %c0_11 = arith.constant 0 : index
    %5 = vector.load %arg1[%c0_9, %c0_10, %c0_11] : memref<2x8x256xf32, #tpu.memory_space<vmem>>, vector<2x8x256xf32>
    %c0_12 = arith.constant 0 : index
    %c0_13 = arith.constant 0 : index
    %c128 = arith.constant 128 : index
    %6 = vector.load %arg10[%c0_12, %c0_13, %c128] : memref<2x8x512xf32, #tpu.memory_space<vmem>>, vector<2x8x256xf32>
    tpu.vector_store %arg10[%c0_12, %c0_13, %c128], %5 {strides = array<i32>} : memref<2x8x512xf32, #tpu.memory_space<vmem>>, vector<2x8x256xf32>,
    %c0_14 = arith.constant 0 : index
    %c0_15 = arith.constant 0 : index
    %7 = vector.load %arg6[%c0_14, %c0_15] : memref<3x256xf32, #tpu.memory_space<vmem>>, vector<1x256xf32>
    %8 = vector.shape_cast %7 : vector<1x256xf32> to vector<1x256xf32>
    %9 = vector.broadcast %8 : vector<1x256xf32> to vector<8x256xf32>
    %c2 = arith.constant 2 : index
    %c0_16 = arith.constant 0 : index
    %10 = vector.load %arg6[%c2, %c0_16] : memref<3x256xf32, #tpu.memory_space<vmem>>, vector<1x256xf32>
    %11 = vector.shape_cast %10 : vector<1x256xf32> to vector<1x256xf32>
    %12 = vector.broadcast %11 : vector<1x256xf32> to vector<8x256xf32>
    %c0_17 = arith.constant 0 : index
    %c0_18 = arith.constant 0 : index
    %13 = vector.load %arg2[%c0_17, %c0_18] : memref<8x72xf32, #tpu.memory_space<vmem>>, vector<8x72xf32>
    %c0_19 = arith.constant 0 : index
    %c0_20 = arith.constant 0 : index
    %14 = vector.load %arg4[%c0_19, %c0_20] : memref<8x72xf32, #tpu.memory_space<vmem>>, vector<8x72xf32>
    %c0_21 = arith.constant 0 : index
    %c0_22 = arith.constant 0 : index
    %15 = vector.load %arg3[%c0_21, %c0_22] : memref<8x1xf32, #tpu.memory_space<vmem>>, vector<8x1xf32>
    %c0_23 = arith.constant 0 : index
    %c0_24 = arith.constant 0 : index
    %16 = vector.load %arg5[%c0_23, %c0_24] : memref<8x1xf32, #tpu.memory_space<vmem>>, vector<8x1xf32>
    %c0_25 = arith.constant 0 : index
    %c0_26 = arith.constant 0 : index
    %17 = vector.load %arg7[%c0_25, %c0_26] : memref<2x8xf32, #tpu.memory_space<vmem>>, vector<2x8xf32>
    %c0_27 = arith.constant 0 : index
    %c0_28 = arith.constant 0 : index
    %18 = vector.load %arg8[%c0_27, %c0_28] : memref<8x2xf32, #tpu.memory_space<vmem>>, vector<8x2xf32>
    %c0_29 = arith.constant 0 : index
    %c0_30 = arith.constant 0 : index
    %c111_31 = arith.constant 111 : index
    %19 = vector.load %arg10[%c0_29, %c0_30, %c111_31] : memref<2x8x512xf32, #tpu.memory_space<vmem>>, vector<1x8x256xf32>
    %20 = vector.shape_cast %19 : vector<1x8x256xf32> to vector<8x256xf32>
    %21 = arith.mulf %20, %9 : vector<8x256xf32>
    %c0_32 = arith.constant 0 : index
    %c0_33 = arith.constant 0 : index
    %c112 = arith.constant 112 : index
    %22 = vector.load %arg10[%c0_32, %c0_33, %c112] : memref<2x8x512xf32, #tpu.memory_space<vmem>>, vector<1x8x256xf32>
    %23 = vector.shape_cast %22 : vector<1x8x256xf32> to vector<8x256xf32>
    %c0_34 = arith.constant 0 : index
    %c0_35 = arith.constant 0 : index
    %c113 = arith.constant 113 : index
    %24 = vector.load %arg10[%c0_34, %c0_35, %c113] : memref<2x8x512xf32, #tpu.memory_space<vmem>>, vector<1x8x256xf32>
    %25 = vector.shape_cast %24 : vector<1x8x256xf32> to vector<8x256xf32>
    %26 = arith.mulf %25, %12 : vector<8x256xf32>
    %c0_36 = arith.constant 0 : index
    %c0_37 = arith.constant 0 : index
    %c127 = arith.constant 127 : index
    %27 = vector.load %arg10[%c0_36, %c0_37, %c127] : memref<2x8x512xf32, #tpu.memory_space<vmem>>, vector<1x8x256xf32>
    %28 = vector.shape_cast %27 : vector<1x8x256xf32> to vector<8x256xf32>
    %29 = arith.mulf %28, %9 : vector<8x256xf32>
    %c0_38 = arith.constant 0 : index
    %c0_39 = arith.constant 0 : index
    %c128_40 = arith.constant 128 : index
    %30 = vector.load %arg10[%c0_38, %c0_39, %c128_40] : memref<2x8x512xf32, #tpu.memory_space<vmem>>, vector<1x8x256xf32>
    %31 = vector.shape_cast %30 : vector<1x8x256xf32> to vector<8x256xf32>
    %c0_41 = arith.constant 0 : index
    %c0_42 = arith.constant 0 : index
    %c129 = arith.constant 129 : index
    %32 = vector.load %arg10[%c0_41, %c0_42, %c129] : memref<2x8x512xf32, #tpu.memory_space<vmem>>, vector<1x8x256xf32>
    %33 = vector.shape_cast %32 : vector<1x8x256xf32> to vector<8x256xf32>
    %34 = arith.mulf %33, %12 : vector<8x256xf32>
    %c0_43 = arith.constant 0 : index
    %c0_44 = arith.constant 0 : index
    %c143 = arith.constant 143 : index
    %35 = vector.load %arg10[%c0_43, %c0_44, %c143] : memref<2x8x512xf32, #tpu.memory_space<vmem>>, vector<1x8x256xf32>
    %36 = vector.shape_cast %35 : vector<1x8x256xf32> to vector<8x256xf32>
    %37 = arith.mulf %36, %9 : vector<8x256xf32>
    %c0_45 = arith.constant 0 : index
    %c0_46 = arith.constant 0 : index
    %c144 = arith.constant 144 : index
    %38 = vector.load %arg10[%c0_45, %c0_46, %c144] : memref<2x8x512xf32, #tpu.memory_space<vmem>>, vector<1x8x256xf32>
    %39 = vector.shape_cast %38 : vector<1x8x256xf32> to vector<8x256xf32>
    %c0_47 = arith.constant 0 : index
    %c0_48 = arith.constant 0 : index
    %c145 = arith.constant 145 : index
    %40 = vector.load %arg10[%c0_47, %c0_48, %c145] : memref<2x8x512xf32, #tpu.memory_space<vmem>>, vector<1x8x256xf32>
    %41 = vector.shape_cast %40 : vector<1x8x256xf32> to vector<8x256xf32>
    %42 = arith.mulf %41, %12 : vector<8x256xf32>
    %43 = tpu.concatenate %21, %23, %26, %29, %31, %34, %37, %39, %42 in 0 : vector<8x256xf32>, vector<8x256xf32>, vector<8x256xf32>, vector<8x256xf32>, vector<8x256xf32>, vector<8x256xf32>, vector<8x256xf32>, vector<8x256xf32>, vector<8x256xf32> -> vector<72x256xf32>
    %cst_49 = arith.constant dense<0.000000e+00> : vector<8x256xf32>
    %44 = tpu.matmul %13, %43, %cst_49 {dimension_numbers = #tpu.dot_dimension_numbers<[1], [0], [0], [1], [0, 0, 1, 1], [], []>} : vector<8x72xf32>, vector<72x256xf32>, vector<8x256xf32> -> vector<8x256xf32>
    %45 = vector.broadcast %15 : vector<8x1xf32> to vector<8x256xf32>
    %46 = arith.addf %44, %45 : vector<8x256xf32>
    %47 = math.absf %46 : vector<8x256xf32>
    %cst_50 = arith.constant 0.000000e+00 : f32
    %48 = vector.broadcast %cst_50 : f32 to vector<8x256xf32>
    %49 = arith.subf %48, %47 : vector<8x256xf32>
    %50 = math.exp %49 : vector<8x256xf32>
    %51 = arith.mulf %50, %50 : vector<8x256xf32>
    %cst_51 = arith.constant 0.000000e+00 : f32
    %52 = vector.broadcast %cst_51 : f32 to vector<8x256xf32>
    %53 = arith.cmpf oge, %46, %52 : vector<8x256xf32>
    %cst_52 = arith.constant 2.000000e+00 : f32
    %54 = vector.broadcast %cst_52 : f32 to vector<8x256xf32>
    %55 = arith.mulf %54, %50 : vector<8x256xf32>
    %cst_53 = arith.constant 1.000000e+00 : f32
    %56 = vector.broadcast %cst_53 : f32 to vector<8x256xf32>
    %57 = arith.addf %56, %55 : vector<8x256xf32>
    %cst_54 = arith.constant 2.000000e+00 : f32
    %58 = vector.broadcast %cst_54 : f32 to vector<8x256xf32>
    %59 = arith.mulf %58, %50 : vector<8x256xf32>
    %60 = arith.addf %51, %59 : vector<8x256xf32>
    %61 = arith.select %53, %57, %60 : vector<8x256xi1>, vector<8x256xf32>
    %cst_55 = arith.constant 0.000000e+00 : f32
    %62 = vector.broadcast %cst_55 : f32 to vector<8x256xf32>
    %63 = arith.cmpf oge, %46, %62 : vector<8x256xf32>
    %cst_56 = arith.constant 2.000000e+00 : f32
    %64 = vector.broadcast %cst_56 : f32 to vector<8x256xf32>
    %65 = arith.mulf %64, %51 : vector<8x256xf32>
    %cst_57 = arith.constant 2.000000e+00 : f32
    %66 = vector.broadcast %cst_57 : f32 to vector<8x256xf32>
    %67 = arith.select %63, %65, %66 : vector<8x256xi1>, vector<8x256xf32>
    %68 = arith.addf %61, %67 : vector<8x256xf32>
    %69 = tpu.reciprocal %68 {approx = true} : vector<8x256xf32> -> vector<8x256xf32>
    %70 = arith.mulf %68, %69 : vector<8x256xf32>
    %cst_58 = arith.constant 2.000000e+00 : f32
    %71 = vector.broadcast %cst_58 : f32 to vector<8x256xf32>
    %72 = arith.subf %71, %70 : vector<8x256xf32>
    %73 = arith.mulf %69, %72 : vector<8x256xf32>
    %74 = arith.mulf %46, %61 : vector<8x256xf32>
    %75 = arith.mulf %74, %73 : vector<8x256xf32>
    %c0_59 = arith.constant 0 : index
    %c0_60 = arith.constant 0 : index
    %c128_61 = arith.constant 128 : index
    %76 = vector.load %arg11[%c0_59, %c0_60, %c128_61] : memref<2x8x512xf32, #tpu.memory_space<vmem>>, vector<1x8x256xf32>
    %77 = vector.shape_cast %76 : vector<1x8x256xf32> to vector<8x256xf32>
    %78 = vector.shape_cast %75 : vector<8x256xf32> to vector<1x8x256xf32>
    tpu.vector_store %arg11[%c0_59, %c0_60, %c128_61], %78 {strides = array<i32>} : memref<2x8x512xf32, #tpu.memory_space<vmem>>, vector<1x8x256xf32>,
    %c0_62 = arith.constant 0 : index
    %c0_63 = arith.constant 0 : index
    %c111_64 = arith.constant 111 : index
    %79 = vector.load %arg11[%c0_62, %c0_63, %c111_64] : memref<2x8x512xf32, #tpu.memory_space<vmem>>, vector<1x8x256xf32>
    %80 = vector.shape_cast %79 : vector<1x8x256xf32> to vector<8x256xf32>
    %81 = arith.mulf %80, %9 : vector<8x256xf32>
    %c0_65 = arith.constant 0 : index
    %c0_66 = arith.constant 0 : index
    %c112_67 = arith.constant 112 : index
    %82 = vector.load %arg11[%c0_65, %c0_66, %c112_67] : memref<2x8x512xf32, #tpu.memory_space<vmem>>, vector<1x8x256xf32>
    %83 = vector.shape_cast %82 : vector<1x8x256xf32> to vector<8x256xf32>
    %c0_68 = arith.constant 0 : index
    %c0_69 = arith.constant 0 : index
    %c113_70 = arith.constant 113 : index
    %84 = vector.load %arg11[%c0_68, %c0_69, %c113_70] : memref<2x8x512xf32, #tpu.memory_space<vmem>>, vector<1x8x256xf32>
    %85 = vector.shape_cast %84 : vector<1x8x256xf32> to vector<8x256xf32>
    %86 = arith.mulf %85, %12 : vector<8x256xf32>
    %c0_71 = arith.constant 0 : index
    %c0_72 = arith.constant 0 : index
    %c127_73 = arith.constant 127 : index
    %87 = vector.load %arg11[%c0_71, %c0_72, %c127_73] : memref<2x8x512xf32, #tpu.memory_space<vmem>>, vector<1x8x256xf32>
    %88 = vector.shape_cast %87 : vector<1x8x256xf32> to vector<8x256xf32>
    %89 = arith.mulf %88, %9 : vector<8x256xf32>
    %c0_74 = arith.constant 0 : index
    %c0_75 = arith.constant 0 : index
    %c128_76 = arith.constant 128 : index
    %90 = vector.load %arg11[%c0_74, %c0_75, %c128_76] : memref<2x8x512xf32, #tpu.memory_space<vmem>>, vector<1x8x256xf32>
    %91 = vector.shape_cast %90 : vector<1x8x256xf32> to vector<8x256xf32>
    %c0_77 = arith.constant 0 : index
    %c0_78 = arith.constant 0 : index
    %c129_79 = arith.constant 129 : index
    %92 = vector.load %arg11[%c0_77, %c0_78, %c129_79] : memref<2x8x512xf32, #tpu.memory_space<vmem>>, vector<1x8x256xf32>
    %93 = vector.shape_cast %92 : vector<1x8x256xf32> to vector<8x256xf32>
    %94 = arith.mulf %93, %12 : vector<8x256xf32>
    %c0_80 = arith.constant 0 : index
    %c0_81 = arith.constant 0 : index
    %c143_82 = arith.constant 143 : index
    %95 = vector.load %arg11[%c0_80, %c0_81, %c143_82] : memref<2x8x512xf32, #tpu.memory_space<vmem>>, vector<1x8x256xf32>
    %96 = vector.shape_cast %95 : vector<1x8x256xf32> to vector<8x256xf32>
    %97 = arith.mulf %96, %9 : vector<8x256xf32>
    %c0_83 = arith.constant 0 : index
    %c0_84 = arith.constant 0 : index
    %c144_85 = arith.constant 144 : index
    %98 = vector.load %arg11[%c0_83, %c0_84, %c144_85] : memref<2x8x512xf32, #tpu.memory_space<vmem>>, vector<1x8x256xf32>
    %99 = vector.shape_cast %98 : vector<1x8x256xf32> to vector<8x256xf32>
    %c0_86 = arith.constant 0 : index
    %c0_87 = arith.constant 0 : index
    %c145_88 = arith.constant 145 : index
    %100 = vector.load %arg11[%c0_86, %c0_87, %c145_88] : memref<2x8x512xf32, #tpu.memory_space<vmem>>, vector<1x8x256xf32>
    %101 = vector.shape_cast %100 : vector<1x8x256xf32> to vector<8x256xf32>
    %102 = arith.mulf %101, %12 : vector<8x256xf32>
    %103 = tpu.concatenate %81, %83, %86, %89, %91, %94, %97, %99, %102 in 0 : vector<8x256xf32>, vector<8x256xf32>, vector<8x256xf32>, vector<8x256xf32>, vector<8x256xf32>, vector<8x256xf32>, vector<8x256xf32>, vector<8x256xf32>, vector<8x256xf32> -> vector<72x256xf32>
    %cst_89 = arith.constant dense<0.000000e+00> : vector<8x256xf32>
    %104 = tpu.matmul %14, %103, %cst_89 {dimension_numbers = #tpu.dot_dimension_numbers<[1], [0], [0], [1], [0, 0, 1, 1], [], []>} : vector<8x72xf32>, vector<72x256xf32>, vector<8x256xf32> -> vector<8x256xf32>
    %105 = vector.broadcast %16 : vector<8x1xf32> to vector<8x256xf32>
    %106 = arith.addf %104, %105 : vector<8x256xf32>
    %cst_90 = arith.constant dense<0.000000e+00> : vector<8xf32>
    %107 = vector.multi_reduction <add>, %106, %cst_90 [1] : vector<8x256xf32> to vector<8xf32>
    %108 = vector.shape_cast %107 : vector<8xf32> to vector<8x1xf32>
    %cst_91 = arith.constant 3.906250e-03 : f32
    %109 = vector.broadcast %cst_91 : f32 to vector<8x1xf32>
    %110 = arith.mulf %108, %109 : vector<8x1xf32>
    %cst_92 = arith.constant dense<0.000000e+00> : vector<2x1xf32>
    %111 = tpu.matmul %17, %110, %cst_92 {dimension_numbers = #tpu.dot_dimension_numbers<[1], [0], [0], [1], [0, 0, 1, 1], [], []>} : vector<2x8xf32>, vector<8x1xf32>, vector<2x1xf32> -> vector<2x1xf32>
    %112 = math.absf %111 : vector<2x1xf32>
    %cst_93 = arith.constant 0.000000e+00 : f32
    %113 = vector.broadcast %cst_93 : f32 to vector<2x1xf32>
    %114 = arith.subf %113, %112 : vector<2x1xf32>
    %115 = math.exp %114 : vector<2x1xf32>
    %116 = arith.mulf %115, %115 : vector<2x1xf32>
    %cst_94 = arith.constant 0.000000e+00 : f32
    %117 = vector.broadcast %cst_94 : f32 to vector<2x1xf32>
    %118 = arith.cmpf oge, %111, %117 : vector<2x1xf32>
    %cst_95 = arith.constant 2.000000e+00 : f32
    %119 = vector.broadcast %cst_95 : f32 to vector<2x1xf32>
    %120 = arith.mulf %119, %115 : vector<2x1xf32>
    %cst_96 = arith.constant 1.000000e+00 : f32
    %121 = vector.broadcast %cst_96 : f32 to vector<2x1xf32>
    %122 = arith.addf %121, %120 : vector<2x1xf32>
    %cst_97 = arith.constant 2.000000e+00 : f32
    %123 = vector.broadcast %cst_97 : f32 to vector<2x1xf32>
    %124 = arith.mulf %123, %115 : vector<2x1xf32>
    %125 = arith.addf %116, %124 : vector<2x1xf32>
    %126 = arith.select %118, %122, %125 : vector<2x1xi1>, vector<2x1xf32>
    %cst_98 = arith.constant 0.000000e+00 : f32
    %127 = vector.broadcast %cst_98 : f32 to vector<2x1xf32>
    %128 = arith.cmpf oge, %111, %127 : vector<2x1xf32>
    %cst_99 = arith.constant 2.000000e+00 : f32
    %129 = vector.broadcast %cst_99 : f32 to vector<2x1xf32>
    %130 = arith.mulf %129, %116 : vector<2x1xf32>
    %cst_100 = arith.constant 2.000000e+00 : f32
    %131 = vector.broadcast %cst_100 : f32 to vector<2x1xf32>
    %132 = arith.select %128, %130, %131 : vector<2x1xi1>, vector<2x1xf32>
    %133 = arith.addf %126, %132 : vector<2x1xf32>
    %134 = tpu.reciprocal %133 {approx = true} : vector<2x1xf32> -> vector<2x1xf32>
    %135 = arith.mulf %133, %134 : vector<2x1xf32>
    %cst_101 = arith.constant 2.000000e+00 : f32
    %136 = vector.broadcast %cst_101 : f32 to vector<2x1xf32>
    %137 = arith.subf %136, %135 : vector<2x1xf32>
    %138 = arith.mulf %134, %137 : vector<2x1xf32>
    %139 = arith.mulf %111, %126 : vector<2x1xf32>
    %140 = arith.mulf %139, %138 : vector<2x1xf32>
    %cst_102 = arith.constant dense<0.000000e+00> : vector<8x1xf32>
    %141 = tpu.matmul %18, %140, %cst_102 {dimension_numbers = #tpu.dot_dimension_numbers<[1], [0], [0], [1], [0, 0, 1, 1], [], []>} : vector<8x2xf32>, vector<2x1xf32>, vector<8x1xf32> -> vector<8x1xf32>
    %cst_103 = arith.constant 5.000000e-01 : f32
    %142 = vector.broadcast %cst_103 : f32 to vector<8x1xf32>
    %143 = arith.mulf %142, %141 : vector<8x1xf32>
    %144 = math.tanh %143 : vector<8x1xf32>
    %cst_104 = arith.constant 1.000000e+00 : f32
    %145 = vector.broadcast %cst_104 : f32 to vector<8x1xf32>
    %146 = arith.addf %144, %145 : vector<8x1xf32>
    %cst_105 = arith.constant 5.000000e-01 : f32
    %147 = vector.broadcast %cst_105 : f32 to vector<8x1xf32>
    %148 = arith.mulf %147, %146 : vector<8x1xf32>
    %149 = vector.broadcast %148 : vector<8x1xf32> to vector<8x256xf32>
    %150 = arith.mulf %106, %149 : vector<8x256xf32>
    %c0_106 = arith.constant 0 : index
    %c0_107 = arith.constant 0 : index
    %c0_108 = arith.constant 0 : index
    %151 = vector.load %arg1[%c0_106, %c0_107, %c0_108] : memref<2x8x256xf32, #tpu.memory_space<vmem>>, vector<1x8x256xf32>
    %152 = vector.shape_cast %151 : vector<1x8x256xf32> to vector<8x256xf32>
    %153 = arith.addf %150, %152 : vector<8x256xf32>
    %154 = math.absf %153 : vector<8x256xf32>
    %cst_109 = arith.constant 0.000000e+00 : f32
    %155 = vector.broadcast %cst_109 : f32 to vector<8x256xf32>
    %156 = arith.subf %155, %154 : vector<8x256xf32>
    %157 = math.exp %156 : vector<8x256xf32>
    %158 = arith.mulf %157, %157 : vector<8x256xf32>
    %cst_110 = arith.constant 0.000000e+00 : f32
    %159 = vector.broadcast %cst_110 : f32 to vector<8x256xf32>
    %160 = arith.cmpf oge, %153, %159 : vector<8x256xf32>
    %cst_111 = arith.constant 2.000000e+00 : f32
    %161 = vector.broadcast %cst_111 : f32 to vector<8x256xf32>
    %162 = arith.mulf %161, %157 : vector<8x256xf32>
    %cst_112 = arith.constant 1.000000e+00 : f32
    %163 = vector.broadcast %cst_112 : f32 to vector<8x256xf32>
    %164 = arith.addf %163, %162 : vector<8x256xf32>
    %cst_113 = arith.constant 2.000000e+00 : f32
    %165 = vector.broadcast %cst_113 : f32 to vector<8x256xf32>
    %166 = arith.mulf %165, %157 : vector<8x256xf32>
    %167 = arith.addf %158, %166 : vector<8x256xf32>
    %168 = arith.select %160, %164, %167 : vector<8x256xi1>, vector<8x256xf32>
    %cst_114 = arith.constant 0.000000e+00 : f32
    %169 = vector.broadcast %cst_114 : f32 to vector<8x256xf32>
    %170 = arith.cmpf oge, %153, %169 : vector<8x256xf32>
    %cst_115 = arith.constant 2.000000e+00 : f32
    %171 = vector.broadcast %cst_115 : f32 to vector<8x256xf32>
    %172 = arith.mulf %171, %158 : vector<8x256xf32>
    %cst_116 = arith.constant 2.000000e+00 : f32
    %173 = vector.broadcast %cst_116 : f32 to vector<8x256xf32>
    %174 = arith.select %170, %172, %173 : vector<8x256xi1>, vector<8x256xf32>
    %175 = arith.addf %168, %174 : vector<8x256xf32>
    %176 = tpu.reciprocal %175 {approx = true} : vector<8x256xf32> -> vector<8x256xf32>
    %177 = arith.mulf %175, %176 : vector<8x256xf32>
    %cst_117 = arith.constant 2.000000e+00 : f32
    %178 = vector.broadcast %cst_117 : f32 to vector<8x256xf32>
    %179 = arith.subf %178, %177 : vector<8x256xf32>
    %180 = arith.mulf %176, %179 : vector<8x256xf32>
    %181 = arith.mulf %153, %168 : vector<8x256xf32>
    %182 = arith.mulf %181, %180 : vector<8x256xf32>
    %c0_118 = arith.constant 0 : index
    %c0_119 = arith.constant 0 : index
    %c0_120 = arith.constant 0 : index
    %183 = vector.load %arg9[%c0_118, %c0_119, %c0_120] : memref<2x8x256xf32, #tpu.memory_space<vmem>>, vector<1x8x256xf32>
    %184 = vector.shape_cast %183 : vector<1x8x256xf32> to vector<8x256xf32>
    %185 = vector.shape_cast %182 : vector<8x256xf32> to vector<1x8x256xf32>
    tpu.vector_store %arg9[%c0_118, %c0_119, %c0_120], %185 {strides = array<i32>} : memref<2x8x256xf32, #tpu.memory_space<vmem>>, vector<1x8x256xf32>,
    %c1 = arith.constant 1 : index
    %c0_121 = arith.constant 0 : index
    %c111_122 = arith.constant 111 : index
    %186 = vector.load %arg10[%c1, %c0_121, %c111_122] : memref<2x8x512xf32, #tpu.memory_space<vmem>>, vector<1x8x256xf32>
    %187 = vector.shape_cast %186 : vector<1x8x256xf32> to vector<8x256xf32>
    %188 = arith.mulf %187, %9 : vector<8x256xf32>
    %c1_123 = arith.constant 1 : index
    %c0_124 = arith.constant 0 : index
    %c112_125 = arith.constant 112 : index
    %189 = vector.load %arg10[%c1_123, %c0_124, %c112_125] : memref<2x8x512xf32, #tpu.memory_space<vmem>>, vector<1x8x256xf32>
    %190 = vector.shape_cast %189 : vector<1x8x256xf32> to vector<8x256xf32>
    %c1_126 = arith.constant 1 : index
    %c0_127 = arith.constant 0 : index
    %c113_128 = arith.constant 113 : index
    %191 = vector.load %arg10[%c1_126, %c0_127, %c113_128] : memref<2x8x512xf32, #tpu.memory_space<vmem>>, vector<1x8x256xf32>
    %192 = vector.shape_cast %191 : vector<1x8x256xf32> to vector<8x256xf32>
    %193 = arith.mulf %192, %12 : vector<8x256xf32>
    %c1_129 = arith.constant 1 : index
    %c0_130 = arith.constant 0 : index
    %c127_131 = arith.constant 127 : index
    %194 = vector.load %arg10[%c1_129, %c0_130, %c127_131] : memref<2x8x512xf32, #tpu.memory_space<vmem>>, vector<1x8x256xf32>
    %195 = vector.shape_cast %194 : vector<1x8x256xf32> to vector<8x256xf32>
    %196 = arith.mulf %195, %9 : vector<8x256xf32>
    %c1_132 = arith.constant 1 : index
    %c0_133 = arith.constant 0 : index
    %c128_134 = arith.constant 128 : index
    %197 = vector.load %arg10[%c1_132, %c0_133, %c128_134] : memref<2x8x512xf32, #tpu.memory_space<vmem>>, vector<1x8x256xf32>
    %198 = vector.shape_cast %197 : vector<1x8x256xf32> to vector<8x256xf32>
    %c1_135 = arith.constant 1 : index
    %c0_136 = arith.constant 0 : index
    %c129_137 = arith.constant 129 : index
    %199 = vector.load %arg10[%c1_135, %c0_136, %c129_137] : memref<2x8x512xf32, #tpu.memory_space<vmem>>, vector<1x8x256xf32>
    %200 = vector.shape_cast %199 : vector<1x8x256xf32> to vector<8x256xf32>
    %201 = arith.mulf %200, %12 : vector<8x256xf32>
    %c1_138 = arith.constant 1 : index
    %c0_139 = arith.constant 0 : index
    %c143_140 = arith.constant 143 : index
    %202 = vector.load %arg10[%c1_138, %c0_139, %c143_140] : memref<2x8x512xf32, #tpu.memory_space<vmem>>, vector<1x8x256xf32>
    %203 = vector.shape_cast %202 : vector<1x8x256xf32> to vector<8x256xf32>
    %204 = arith.mulf %203, %9 : vector<8x256xf32>
    %c1_141 = arith.constant 1 : index
    %c0_142 = arith.constant 0 : index
    %c144_143 = arith.constant 144 : index
    %205 = vector.load %arg10[%c1_141, %c0_142, %c144_143] : memref<2x8x512xf32, #tpu.memory_space<vmem>>, vector<1x8x256xf32>
    %206 = vector.shape_cast %205 : vector<1x8x256xf32> to vector<8x256xf32>
    %c1_144 = arith.constant 1 : index
    %c0_145 = arith.constant 0 : index
    %c145_146 = arith.constant 145 : index
    %207 = vector.load %arg10[%c1_144, %c0_145, %c145_146] : memref<2x8x512xf32, #tpu.memory_space<vmem>>, vector<1x8x256xf32>
    %208 = vector.shape_cast %207 : vector<1x8x256xf32> to vector<8x256xf32>
    %209 = arith.mulf %208, %12 : vector<8x256xf32>
    %210 = tpu.concatenate %188, %190, %193, %196, %198, %201, %204, %206, %209 in 0 : vector<8x256xf32>, vector<8x256xf32>, vector<8x256xf32>, vector<8x256xf32>, vector<8x256xf32>, vector<8x256xf32>, vector<8x256xf32>, vector<8x256xf32>, vector<8x256xf32> -> vector<72x256xf32>
    %cst_147 = arith.constant dense<0.000000e+00> : vector<8x256xf32>
    %211 = tpu.matmul %13, %210, %cst_147 {dimension_numbers = #tpu.dot_dimension_numbers<[1], [0], [0], [1], [0, 0, 1, 1], [], []>} : vector<8x72xf32>, vector<72x256xf32>, vector<8x256xf32> -> vector<8x256xf32>
    %212 = vector.broadcast %15 : vector<8x1xf32> to vector<8x256xf32>
    %213 = arith.addf %211, %212 : vector<8x256xf32>
    %214 = math.absf %213 : vector<8x256xf32>
    %cst_148 = arith.constant 0.000000e+00 : f32
    %215 = vector.broadcast %cst_148 : f32 to vector<8x256xf32>
    %216 = arith.subf %215, %214 : vector<8x256xf32>
    %217 = math.exp %216 : vector<8x256xf32>
    %218 = arith.mulf %217, %217 : vector<8x256xf32>
    %cst_149 = arith.constant 0.000000e+00 : f32
    %219 = vector.broadcast %cst_149 : f32 to vector<8x256xf32>
    %220 = arith.cmpf oge, %213, %219 : vector<8x256xf32>
    %cst_150 = arith.constant 2.000000e+00 : f32
    %221 = vector.broadcast %cst_150 : f32 to vector<8x256xf32>
    %222 = arith.mulf %221, %217 : vector<8x256xf32>
    %cst_151 = arith.constant 1.000000e+00 : f32
    %223 = vector.broadcast %cst_151 : f32 to vector<8x256xf32>
    %224 = arith.addf %223, %222 : vector<8x256xf32>
    %cst_152 = arith.constant 2.000000e+00 : f32
    %225 = vector.broadcast %cst_152 : f32 to vector<8x256xf32>
    %226 = arith.mulf %225, %217 : vector<8x256xf32>
    %227 = arith.addf %218, %226 : vector<8x256xf32>
    %228 = arith.select %220, %224, %227 : vector<8x256xi1>, vector<8x256xf32>
    %cst_153 = arith.constant 0.000000e+00 : f32
    %229 = vector.broadcast %cst_153 : f32 to vector<8x256xf32>
    %230 = arith.cmpf oge, %213, %229 : vector<8x256xf32>
    %cst_154 = arith.constant 2.000000e+00 : f32
    %231 = vector.broadcast %cst_154 : f32 to vector<8x256xf32>
    %232 = arith.mulf %231, %218 : vector<8x256xf32>
    %cst_155 = arith.constant 2.000000e+00 : f32
    %233 = vector.broadcast %cst_155 : f32 to vector<8x256xf32>
    %234 = arith.select %230, %232, %233 : vector<8x256xi1>, vector<8x256xf32>
    %235 = arith.addf %228, %234 : vector<8x256xf32>
    %236 = tpu.reciprocal %235 {approx = true} : vector<8x256xf32> -> vector<8x256xf32>
    %237 = arith.mulf %235, %236 : vector<8x256xf32>
    %cst_156 = arith.constant 2.000000e+00 : f32
    %238 = vector.broadcast %cst_156 : f32 to vector<8x256xf32>
    %239 = arith.subf %238, %237 : vector<8x256xf32>
    %240 = arith.mulf %236, %239 : vector<8x256xf32>
    %241 = arith.mulf %213, %228 : vector<8x256xf32>
    %242 = arith.mulf %241, %240 : vector<8x256xf32>
    %c1_157 = arith.constant 1 : index
    %c0_158 = arith.constant 0 : index
    %c128_159 = arith.constant 128 : index
    %243 = vector.load %arg11[%c1_157, %c0_158, %c128_159] : memref<2x8x512xf32, #tpu.memory_space<vmem>>, vector<1x8x256xf32>
    %244 = vector.shape_cast %243 : vector<1x8x256xf32> to vector<8x256xf32>
    %245 = vector.shape_cast %242 : vector<8x256xf32> to vector<1x8x256xf32>
    tpu.vector_store %arg11[%c1_157, %c0_158, %c128_159], %245 {strides = array<i32>} : memref<2x8x512xf32, #tpu.memory_space<vmem>>, vector<1x8x256xf32>,
    %c1_160 = arith.constant 1 : index
    %c0_161 = arith.constant 0 : index
    %c111_162 = arith.constant 111 : index
    %246 = vector.load %arg11[%c1_160, %c0_161, %c111_162] : memref<2x8x512xf32, #tpu.memory_space<vmem>>, vector<1x8x256xf32>
    %247 = vector.shape_cast %246 : vector<1x8x256xf32> to vector<8x256xf32>
    %248 = arith.mulf %247, %9 : vector<8x256xf32>
    %c1_163 = arith.constant 1 : index
    %c0_164 = arith.constant 0 : index
    %c112_165 = arith.constant 112 : index
    %249 = vector.load %arg11[%c1_163, %c0_164, %c112_165] : memref<2x8x512xf32, #tpu.memory_space<vmem>>, vector<1x8x256xf32>
    %250 = vector.shape_cast %249 : vector<1x8x256xf32> to vector<8x256xf32>
    %c1_166 = arith.constant 1 : index
    %c0_167 = arith.constant 0 : index
    %c113_168 = arith.constant 113 : index
    %251 = vector.load %arg11[%c1_166, %c0_167, %c113_168] : memref<2x8x512xf32, #tpu.memory_space<vmem>>, vector<1x8x256xf32>
    %252 = vector.shape_cast %251 : vector<1x8x256xf32> to vector<8x256xf32>
    %253 = arith.mulf %252, %12 : vector<8x256xf32>
    %c1_169 = arith.constant 1 : index
    %c0_170 = arith.constant 0 : index
    %c127_171 = arith.constant 127 : index
    %254 = vector.load %arg11[%c1_169, %c0_170, %c127_171] : memref<2x8x512xf32, #tpu.memory_space<vmem>>, vector<1x8x256xf32>
    %255 = vector.shape_cast %254 : vector<1x8x256xf32> to vector<8x256xf32>
    %256 = arith.mulf %255, %9 : vector<8x256xf32>
    %c1_172 = arith.constant 1 : index
    %c0_173 = arith.constant 0 : index
    %c128_174 = arith.constant 128 : index
    %257 = vector.load %arg11[%c1_172, %c0_173, %c128_174] : memref<2x8x512xf32, #tpu.memory_space<vmem>>, vector<1x8x256xf32>
    %258 = vector.shape_cast %257 : vector<1x8x256xf32> to vector<8x256xf32>
    %c1_175 = arith.constant 1 : index
    %c0_176 = arith.constant 0 : index
    %c129_177 = arith.constant 129 : index
    %259 = vector.load %arg11[%c1_175, %c0_176, %c129_177] : memref<2x8x512xf32, #tpu.memory_space<vmem>>, vector<1x8x256xf32>
    %260 = vector.shape_cast %259 : vector<1x8x256xf32> to vector<8x256xf32>
    %261 = arith.mulf %260, %12 : vector<8x256xf32>
    %c1_178 = arith.constant 1 : index
    %c0_179 = arith.constant 0 : index
    %c143_180 = arith.constant 143 : index
    %262 = vector.load %arg11[%c1_178, %c0_179, %c143_180] : memref<2x8x512xf32, #tpu.memory_space<vmem>>, vector<1x8x256xf32>
    %263 = vector.shape_cast %262 : vector<1x8x256xf32> to vector<8x256xf32>
    %264 = arith.mulf %263, %9 : vector<8x256xf32>
    %c1_181 = arith.constant 1 : index
    %c0_182 = arith.constant 0 : index
    %c144_183 = arith.constant 144 : index
    %265 = vector.load %arg11[%c1_181, %c0_182, %c144_183] : memref<2x8x512xf32, #tpu.memory_space<vmem>>, vector<1x8x256xf32>
    %266 = vector.shape_cast %265 : vector<1x8x256xf32> to vector<8x256xf32>
    %c1_184 = arith.constant 1 : index
    %c0_185 = arith.constant 0 : index
    %c145_186 = arith.constant 145 : index
    %267 = vector.load %arg11[%c1_184, %c0_185, %c145_186] : memref<2x8x512xf32, #tpu.memory_space<vmem>>, vector<1x8x256xf32>
    %268 = vector.shape_cast %267 : vector<1x8x256xf32> to vector<8x256xf32>
    %269 = arith.mulf %268, %12 : vector<8x256xf32>
    %270 = tpu.concatenate %248, %250, %253, %256, %258, %261, %264, %266, %269 in 0 : vector<8x256xf32>, vector<8x256xf32>, vector<8x256xf32>, vector<8x256xf32>, vector<8x256xf32>, vector<8x256xf32>, vector<8x256xf32>, vector<8x256xf32>, vector<8x256xf32> -> vector<72x256xf32>
    %cst_187 = arith.constant dense<0.000000e+00> : vector<8x256xf32>
    %271 = tpu.matmul %14, %270, %cst_187 {dimension_numbers = #tpu.dot_dimension_numbers<[1], [0], [0], [1], [0, 0, 1, 1], [], []>} : vector<8x72xf32>, vector<72x256xf32>, vector<8x256xf32> -> vector<8x256xf32>
    %272 = vector.broadcast %16 : vector<8x1xf32> to vector<8x256xf32>
    %273 = arith.addf %271, %272 : vector<8x256xf32>
    %cst_188 = arith.constant dense<0.000000e+00> : vector<8xf32>
    %274 = vector.multi_reduction <add>, %273, %cst_188 [1] : vector<8x256xf32> to vector<8xf32>
    %275 = vector.shape_cast %274 : vector<8xf32> to vector<8x1xf32>
    %cst_189 = arith.constant 3.906250e-03 : f32
    %276 = vector.broadcast %cst_189 : f32 to vector<8x1xf32>
    %277 = arith.mulf %275, %276 : vector<8x1xf32>
    %cst_190 = arith.constant dense<0.000000e+00> : vector<2x1xf32>
    %278 = tpu.matmul %17, %277, %cst_190 {dimension_numbers = #tpu.dot_dimension_numbers<[1], [0], [0], [1], [0, 0, 1, 1], [], []>} : vector<2x8xf32>, vector<8x1xf32>, vector<2x1xf32> -> vector<2x1xf32>
    %279 = math.absf %278 : vector<2x1xf32>
    %cst_191 = arith.constant 0.000000e+00 : f32
    %280 = vector.broadcast %cst_191 : f32 to vector<2x1xf32>
    %281 = arith.subf %280, %279 : vector<2x1xf32>
    %282 = math.exp %281 : vector<2x1xf32>
    %283 = arith.mulf %282, %282 : vector<2x1xf32>
    %cst_192 = arith.constant 0.000000e+00 : f32
    %284 = vector.broadcast %cst_192 : f32 to vector<2x1xf32>
    %285 = arith.cmpf oge, %278, %284 : vector<2x1xf32>
    %cst_193 = arith.constant 2.000000e+00 : f32
    %286 = vector.broadcast %cst_193 : f32 to vector<2x1xf32>
    %287 = arith.mulf %286, %282 : vector<2x1xf32>
    %cst_194 = arith.constant 1.000000e+00 : f32
    %288 = vector.broadcast %cst_194 : f32 to vector<2x1xf32>
    %289 = arith.addf %288, %287 : vector<2x1xf32>
    %cst_195 = arith.constant 2.000000e+00 : f32
    %290 = vector.broadcast %cst_195 : f32 to vector<2x1xf32>
    %291 = arith.mulf %290, %282 : vector<2x1xf32>
    %292 = arith.addf %283, %291 : vector<2x1xf32>
    %293 = arith.select %285, %289, %292 : vector<2x1xi1>, vector<2x1xf32>
    %cst_196 = arith.constant 0.000000e+00 : f32
    %294 = vector.broadcast %cst_196 : f32 to vector<2x1xf32>
    %295 = arith.cmpf oge, %278, %294 : vector<2x1xf32>
    %cst_197 = arith.constant 2.000000e+00 : f32
    %296 = vector.broadcast %cst_197 : f32 to vector<2x1xf32>
    %297 = arith.mulf %296, %283 : vector<2x1xf32>
    %cst_198 = arith.constant 2.000000e+00 : f32
    %298 = vector.broadcast %cst_198 : f32 to vector<2x1xf32>
    %299 = arith.select %295, %297, %298 : vector<2x1xi1>, vector<2x1xf32>
    %300 = arith.addf %293, %299 : vector<2x1xf32>
    %301 = tpu.reciprocal %300 {approx = true} : vector<2x1xf32> -> vector<2x1xf32>
    %302 = arith.mulf %300, %301 : vector<2x1xf32>
    %cst_199 = arith.constant 2.000000e+00 : f32
    %303 = vector.broadcast %cst_199 : f32 to vector<2x1xf32>
    %304 = arith.subf %303, %302 : vector<2x1xf32>
    %305 = arith.mulf %301, %304 : vector<2x1xf32>
    %306 = arith.mulf %278, %293 : vector<2x1xf32>
    %307 = arith.mulf %306, %305 : vector<2x1xf32>
    %cst_200 = arith.constant dense<0.000000e+00> : vector<8x1xf32>
    %308 = tpu.matmul %18, %307, %cst_200 {dimension_numbers = #tpu.dot_dimension_numbers<[1], [0], [0], [1], [0, 0, 1, 1], [], []>} : vector<8x2xf32>, vector<2x1xf32>, vector<8x1xf32> -> vector<8x1xf32>
    %cst_201 = arith.constant 5.000000e-01 : f32
    %309 = vector.broadcast %cst_201 : f32 to vector<8x1xf32>
    %310 = arith.mulf %309, %308 : vector<8x1xf32>
    %311 = math.tanh %310 : vector<8x1xf32>
    %cst_202 = arith.constant 1.000000e+00 : f32
    %312 = vector.broadcast %cst_202 : f32 to vector<8x1xf32>
    %313 = arith.addf %311, %312 : vector<8x1xf32>
    %cst_203 = arith.constant 5.000000e-01 : f32
    %314 = vector.broadcast %cst_203 : f32 to vector<8x1xf32>
    %315 = arith.mulf %314, %313 : vector<8x1xf32>
    %316 = vector.broadcast %315 : vector<8x1xf32> to vector<8x256xf32>
    %317 = arith.mulf %273, %316 : vector<8x256xf32>
    %c1_204 = arith.constant 1 : index
    %c0_205 = arith.constant 0 : index
    %c0_206 = arith.constant 0 : index
    %318 = vector.load %arg1[%c1_204, %c0_205, %c0_206] : memref<2x8x256xf32, #tpu.memory_space<vmem>>, vector<1x8x256xf32>
    %319 = vector.shape_cast %318 : vector<1x8x256xf32> to vector<8x256xf32>
    %320 = arith.addf %317, %319 : vector<8x256xf32>
    %321 = math.absf %320 : vector<8x256xf32>
    %cst_207 = arith.constant 0.000000e+00 : f32
    %322 = vector.broadcast %cst_207 : f32 to vector<8x256xf32>
    %323 = arith.subf %322, %321 : vector<8x256xf32>
    %324 = math.exp %323 : vector<8x256xf32>
    %325 = arith.mulf %324, %324 : vector<8x256xf32>
    %cst_208 = arith.constant 0.000000e+00 : f32
    %326 = vector.broadcast %cst_208 : f32 to vector<8x256xf32>
    %327 = arith.cmpf oge, %320, %326 : vector<8x256xf32>
    %cst_209 = arith.constant 2.000000e+00 : f32
    %328 = vector.broadcast %cst_209 : f32 to vector<8x256xf32>
    %329 = arith.mulf %328, %324 : vector<8x256xf32>
    %cst_210 = arith.constant 1.000000e+00 : f32
    %330 = vector.broadcast %cst_210 : f32 to vector<8x256xf32>
    %331 = arith.addf %330, %329 : vector<8x256xf32>
    %cst_211 = arith.constant 2.000000e+00 : f32
    %332 = vector.broadcast %cst_211 : f32 to vector<8x256xf32>
    %333 = arith.mulf %332, %324 : vector<8x256xf32>
    %334 = arith.addf %325, %333 : vector<8x256xf32>
    %335 = arith.select %327, %331, %334 : vector<8x256xi1>, vector<8x256xf32>
    %cst_212 = arith.constant 0.000000e+00 : f32
    %336 = vector.broadcast %cst_212 : f32 to vector<8x256xf32>
    %337 = arith.cmpf oge, %320, %336 : vector<8x256xf32>
    %cst_213 = arith.constant 2.000000e+00 : f32
    %338 = vector.broadcast %cst_213 : f32 to vector<8x256xf32>
    %339 = arith.mulf %338, %325 : vector<8x256xf32>
    %cst_214 = arith.constant 2.000000e+00 : f32
    %340 = vector.broadcast %cst_214 : f32 to vector<8x256xf32>
    %341 = arith.select %337, %339, %340 : vector<8x256xi1>, vector<8x256xf32>
    %342 = arith.addf %335, %341 : vector<8x256xf32>
    %343 = tpu.reciprocal %342 {approx = true} : vector<8x256xf32> -> vector<8x256xf32>
    %344 = arith.mulf %342, %343 : vector<8x256xf32>
    %cst_215 = arith.constant 2.000000e+00 : f32
    %345 = vector.broadcast %cst_215 : f32 to vector<8x256xf32>
    %346 = arith.subf %345, %344 : vector<8x256xf32>
    %347 = arith.mulf %343, %346 : vector<8x256xf32>
    %348 = arith.mulf %320, %335 : vector<8x256xf32>
    %349 = arith.mulf %348, %347 : vector<8x256xf32>
    %c1_216 = arith.constant 1 : index
    %c0_217 = arith.constant 0 : index
    %c0_218 = arith.constant 0 : index
    %350 = vector.load %arg9[%c1_216, %c0_217, %c0_218] : memref<2x8x256xf32, #tpu.memory_space<vmem>>, vector<1x8x256xf32>
    %351 = vector.shape_cast %350 : vector<1x8x256xf32> to vector<8x256xf32>
    %352 = vector.shape_cast %349 : vector<8x256xf32> to vector<1x8x256xf32>
    tpu.vector_store %arg9[%c1_216, %c0_217, %c0_218], %352 {strides = array<i32>} : memref<2x8x256xf32, #tpu.memory_space<vmem>>, vector<1x8x256xf32>,
    return
  }
  func.func @transform_0(%arg0: i32) -> (i32, i32, i32) {
    %c0_i32 = arith.constant 0 : i32
    %c0_i32_0 = arith.constant 0 : i32
    %c0_i32_1 = arith.constant 0 : i32
    return %arg0, %c0_i32, %c0_i32_0 : i32, i32, i32
  }
  func.func @transform_1(%arg0: i32) -> (i32, i32) {
    %c0_i32 = arith.constant 0 : i32
    %c0_i32_0 = arith.constant 0 : i32
    %c0_i32_1 = arith.constant 0 : i32
    return %c0_i32, %c0_i32_0 : i32, i32
  }
  func.func @transform_2(%arg0: i32) -> (i32, i32) {
    %c0_i32 = arith.constant 0 : i32
    %c0_i32_0 = arith.constant 0 : i32
    %c0_i32_1 = arith.constant 0 : i32
    return %c0_i32, %c0_i32_0 : i32, i32
  }
  func.func @transform_3(%arg0: i32) -> (i32, i32) {
    %c0_i32 = arith.constant 0 : i32
    %c0_i32_0 = arith.constant 0 : i32
    %c0_i32_1 = arith.constant 0 : i32
    return %c0_i32, %c0_i32_0 : i32, i32
  }
  func.func @transform_4(%arg0: i32) -> (i32, i32) {
    %c0_i32 = arith.constant 0 : i32
    %c0_i32_0 = arith.constant 0 : i32
    %c0_i32_1 = arith.constant 0 : i32
    return %c0_i32, %c0_i32_0 : i32, i32
  }
  func.func @transform_5(%arg0: i32) -> (i32, i32) {
    %c0_i32 = arith.constant 0 : i32
    %c0_i32_0 = arith.constant 0 : i32
    %c0_i32_1 = arith.constant 0 : i32
    return %c0_i32, %c0_i32_0 : i32, i32
  }
  func.func @transform_6(%arg0: i32) -> (i32, i32) {
    %c0_i32 = arith.constant 0 : i32
    %c0_i32_0 = arith.constant 0 : i32
    %c0_i32_1 = arith.constant 0 : i32
    return %c0_i32, %c0_i32_0 : i32, i32
  }
  func.func @transform_7(%arg0: i32) -> (i32, i32) {
    %c0_i32 = arith.constant 0 : i32
    %c0_i32_0 = arith.constant 0 : i32
    %c0_i32_1 = arith.constant 0 : i32
    return %c0_i32, %c0_i32_0 : i32, i32
  }
  func.func @transform_8(%arg0: i32) -> (i32, i32, i32) {
    %c0_i32 = arith.constant 0 : i32
    %c0_i32_0 = arith.constant 0 : i32
    %c0_i32_1 = arith.constant 0 : i32
    return %arg0, %c0_i32, %c0_i32_0 : i32, i32, i32
  }
}

</mosaic_0001>

<bundles_post_ra>
// kernel: tile.26
= control target key start
LH: loop header
LB: loop body
LE: loop exit
PB: predicated region body
PF: predicated region fallthrough
CT: control target
= control target key end

     0   :  { %s28_s0 = inlined_call_operand.vmem [shape: f32[16], index: 0, kind: input, shape index: {}]   ;;  %s29_s1 = inlined_call_operand.vmem [shape: f32[16,16], index: 1, kind: output, shape index: {}]  }
   0x1   :  { %v4_v0 = vld [vmem:[%s28_s0] ss:$0 sm:$0xff] }
   0x2   :  { %5 = vst [vmem:[%s29_s1] sm:$0xff] %v4_v0  ;;  %8 = vst [vmem:[%s29_s1 + $0x8] sm:$0xff] %v4_v0 }

// kernel: tile.29
= control target key start
LH: loop header
LB: loop body
LE: loop exit
PB: predicated region body
PF: predicated region fallthrough
CT: control target
= control target key end

     0   :  { %s7_s6 = smov 3  ;;  %s21_s9 = smov 3  ;;  %vm4_vm0 = vcmask 130048   ;;  %vm11_vm1 = vcmask 1048448   ;;  %vm18_vm2 = vcmask 917248   ;;  %vm25_vm3 = vcmask 786048   ;;  %s128_s0 = inlined_call_operand.vmem [shape: f32[16,16], index: 0, kind: input, shape index: {}]   ;;  %s129_s1 = inlined_call_operand.vmem [shape: f32[1,256], index: 1, kind: output, shape index: {}]  }
   0x1   :  { %v66_v0 = vld [vmem:[%s128_s0 + $0x7] ss:$8 sm:%s7_s6]   ;;  %s81_s10 = smov 112   ;;  %v68_v1 = vld [vmem:[%s128_s0 + $0x5] ss:$8 sm:%s21_s9]   ;;  %s14_s13 = smov 3 }
   0x2   :  { %9 = vrot.lane.b32.xlu0 %v66_v0, %s81_s10  ;;  %s82_s14 = smov 80   ;;  %v67_v2 = vld [vmem:[%s128_s0 + $0x6] ss:$8 sm:%s14_s13]   ;;  %s28_s17 = smov 3  ;;  %vm32_vm4 = vcmask 654848   ;;  %vm39_vm5 = vcmask 523648  }
   0x3   :  { %23 = vrot.lane.b32.xlu1 %v68_v1, %s82_s14  ;;  %v69_v3 = vld [vmem:[%s128_s0 + $0x4] ss:$8 sm:%s28_s17]   ;;  %s35_s20 = smov 3  ;;  %s42_s21 = smov 3  ;;  %vm46_vm6 = vcmask 392448   ;;  %vm53_vm7 = vcmask 261248  }
   0x4   :  { %s83_s22 = smov 96   ;;  %s84_s23 = smov 64   ;;  %v70_v4 = vld [vmem:[%s128_s0 + $0x3] ss:$8 sm:%s35_s20]   ;;  %v71_v5 = vld [vmem:[%s128_s0 + $0x2] ss:$8 sm:%s42_s21]  }
   0x5   :  { %s2_s26 = smov 3  ;;  %s49_s29 = smov 3 }
   0x6   :  { %16 = vrot.lane.b32.xlu0 %v67_v2, %s83_s22  ;;  %v3_v6 = vld [vmem:[%s128_s0] ss:$8 sm:%s2_s26]   ;;  %s85_s3 = smov 48   ;;  %s86_s4 = smov 32  }
   0x7   :  { %30 = vrot.lane.b32.xlu1 %v69_v3, %s84_s23  ;;  %5 = vst.msk [vmem:[#allocation0] ss:$8 sm:$0x3] %vm4_vm0, %v3_v6   ;;  %v72_v7 = vld [vmem:[%s128_s0 + $0x1] ss:$8 sm:%s49_s29]   ;;  %s87_s0 = smov 16  }
   0xa   :  { %37 = vrot.lane.b32.xlu0 %v70_v4, %s85_s3 }
   0xb   :  { %44 = vrot.lane.b32.xlu1 %v71_v5, %s86_s4 }
   0xe   :  { %51 = vrot.lane.b32.xlu0 %v72_v7, %s87_s0 }
  0x74   :  { %v10_v8 = vpop.permute.xlu0 %9  }
  0x75   :  { %12 = vst.msk [vmem:[#allocation0] ss:$8 sm:$0x3] %vm11_vm1, %v10_v8   ;;  %v24_v9 = vpop.permute.xlu1 %23  }
  0x78   :  { %v17_v10 = vpop.permute.xlu0 %16  }
  0x79   :  { %19 = vst.msk [vmem:[#allocation0] ss:$8 sm:$0x3] %vm18_vm2, %v17_v10   ;;  %v31_v11 = vpop.permute.xlu1 %30  }
  0x7a   :  { %26 = vst.msk [vmem:[#allocation0] ss:$8 sm:$0x3] %vm25_vm3, %v24_v9  }
  0x7b   :  { %33 = vst.msk [vmem:[#allocation0] ss:$8 sm:$0x3] %vm32_vm4, %v31_v11  }
  0x7c   :  { %v38_v12 = vpop.permute.xlu0 %37  }
  0x7d   :  { %40 = vst.msk [vmem:[#allocation0] ss:$8 sm:$0x3] %vm39_vm5, %v38_v12   ;;  %v45_v13 = vpop.permute.xlu1 %44  }
  0x7e   :  { %47 = vst.msk [vmem:[#allocation0] ss:$8 sm:$0x3] %vm46_vm6, %v45_v13  }
  0x80   :  { %v52_v14 = vpop.permute.xlu0 %51  }
  0x81   :  { %54 = vst.msk [vmem:[#allocation0] ss:$8 sm:$0x3] %vm53_vm7, %v52_v14  }
  0x88   :  { %v58_v15 = vld [vmem:[#allocation0] sm:$0x1]  ;;  %v62_v16 = vld [vmem:[#allocation0 + $0x8] sm:$0x1] }
  0x89   :  { %60 = vst [vmem:[%s129_s1] sm:$0x1] %v58_v15  ;;  %73 = vst [vmem:[%s129_s1 + $0x1] sm:$0x1] %v62_v16 }

// kernel: residual_block.1
= control target key start
LH: loop header
LB: loop body
LE: loop exit
PB: predicated region body
PF: predicated region fallthrough
CT: control target
= control target key end

     0   :  { %v49_v0 = vlaneseq  ;;  %vm29_vm0 = vcmask 1048440   ;;  %vm32_vm1 = vcmask 138240   ;;  %v2301_v1 = vmov 0.0   ;;  %s2302_s17 = smov 113   ;;  %s2303_s18 = smov 127   ;;  %s2964_s5 = inlined_call_operand.vmem [shape: f32[3,256], index: 5, kind: input, shape index: {}]   ;;  %s2965_s0 = inlined_call_operand.vmem [shape: f32[2,8,256], index: 0, kind: input, shape index: {}]   ;;  %s2966_s2 = inlined_call_operand.vmem [shape: f32[8,1], index: 2, kind: input, shape index: {}]   ;;  %s2967_s1 = inlined_call_operand.vmem [shape: f32[8,72], index: 1, kind: input, shape index: {}]   ;;  %s2968_s4 = inlined_call_operand.vmem [shape: f32[8,1], index: 4, kind: input, shape index: {}]   ;;  %s2969_s3 = inlined_call_operand.vmem [shape: f32[8,72], index: 3, kind: input, shape index: {}]   ;;  %s2970_s6 = inlined_call_operand.vmem [shape: f32[2,8], index: 6, kind: input, shape index: {}]   ;;  %s2971_s7 = inlined_call_operand.vmem [shape: f32[8,2], index: 7, kind: input, shape index: {}]   ;;  %s2972_s8 = inlined_call_operand.vmem [shape: f32[2,8,256], index: 8, kind: output, shape index: {}]  }
   0x1   :  { %30 = vst.msk [vmem:[#allocation2] sm:$0xff] %vm29_vm0, %v2301_v1  ;;  %31 = vst.msk [vmem:[#allocation2 + $0x20] sm:$0xff] %vm29_vm0, %v2301_v1  ;;  %401 = vmatprep.mubr.f32.mxu0 %v2301_v1  ;;  %715 = vmatprep.mubr.f32.mxu1 %v2301_v1  ;;  %v1753_v3 = vld [vmem:[%s2964_s5 + $0x2] ss:$4 sm:$0x3]  ;;  %v2386_v5 = vld [vmem:[%s2965_s0 + $0x8] sm:$0xff] }
   0x2   :  { %35 = vst.msk [vmem:[#allocation3] sm:$0xff] %vm29_vm0, %v2301_v1  ;;  %36 = vst.msk [vmem:[#allocation3 + $0x20] sm:$0xff] %vm29_vm0, %v2301_v1  ;;  %v50_v2 = vshrl.u32 %v49_v0, 7  ;;  %v2381_v4 = vld [vmem:[%s2965_s0] sm:$0xff]  ;;  %v2394_v7 = vld [vmem:[%s2965_s0 + $0x10] sm:$0xff]  ;;  %s2305_s19 = smov 15  }
   0x3   :  { %33 = vst.msk [vmem:[#allocation2 + $0x18] sm:$0xff] %vm32_vm1, %v2301_v1  ;;  %34 = vst.msk [vmem:[#allocation2 + $0x38] sm:$0xff] %vm32_vm1, %v2301_v1  ;;  %v47_v6 = vld [vmem:[%s2964_s5] ss:$4 sm:$0x3]  ;;  %v2399_v8 = vld [vmem:[%s2965_s0 + $0x18] sm:$0xff]  ;;  %v1875_v15 = vpack.i.bf16 %v2386_v5, %v2381_v4 }
   0x4   :  { %37 = vst.msk [vmem:[#allocation3 + $0x18] sm:$0xff] %vm32_vm1, %v2301_v1  ;;  %38 = vst.msk [vmem:[#allocation3 + $0x38] sm:$0xff] %vm32_vm1, %v2301_v1  ;;  %v51_v9 = vsub.s32 0, %v50_v2  ;;  %v55_v10 = vsub.s32 1, %v50_v2  ;;  %s2304_s5 = smov 1   ;;  %s2306_s20 = smov 17  }
   0x5   :  { %s2307_s21 = smov 111   ;;  %vm105_vm2 = vcmask 1039360   ;;  %s2308_s22 = smov 112   ;;  %vm93_vm3 = vcmask 924672   ;;  %vm118_vm4 = vcmask 7168   ;;  %vm130_vm5 = vcmask 121856  }
   0x6   :  { %v63_v11 = vrot.slane %v1753_v3, %v51_v9  ;;  %v52_v12 = vrot.slane %v47_v6, %v51_v9  ;;  %v67_v13 = vrot.slane %v1753_v3, %v55_v10  ;;  %v56_v14 = vrot.slane %v47_v6, %v55_v10  ;;  %s2309_s23 = smov 126   ;;  %s2310_s24 = smov 95  }
   0x7   :  { %s2311_s25 = smov 110   ;;  %vm81_vm6 = vcmask 908288   ;;  %s2312_s26 = smov 96   ;;  %v2314_v6 = vmov 0   ;;  %vm181_vm7 = vcmask 916480   ;;  %vm169_vm8 = vcmask 1031168  }
   0x8   :  { %89 = vrot.lane.b32.xlu0 %v63_v11, %s2302_s17  ;;  %101 = vrot.lane.b32.xlu1 %v52_v12, %s2303_s18  ;;  %v2409_v16 = vld [vmem:[#allocation2] sm:$0xff]  ;;  %s2313_s27 = smov 94   ;;  %vm220_vm9 = vcmask 777216   ;;  %vm198_vm10 = vcmask 900096   ;;  %vm210_vm11 = vcmask 785408   ;;  %vm232_vm12 = vcmask 769024  }
   0x9   :  { %1970 = vset.pattern.permute.xlu1 %v2314_v6  ;;  %2256 = vset.pattern.permute.xlu0 %v2314_v6  ;;  %vm333_vm13 = vcmask 588800   ;;  %vm2315_vm0 = vmmov 0  }
   0xa   :  { %v113_v25 = vld [vmem:[#allocation2 + $0x18] sm:$0xff] }
   0xc   :  { %91 = vrot.lane.b32.xlu0 %v67_v13, %s2302_s17  ;;  %103 = vrot.lane.b32.xlu1 %v56_v14, %s2303_s18 }
  0x10   :  { %114 = vrot.lane.b32.xlu0 %v63_v11, %s2304_s5  ;;  %116 = vrot.lane.b32.xlu1 %v67_v13, %s2304_s5 }
  0x14   :  { %126 = vrot.lane.b32.xlu0 %v52_v12, %s2305_s19  ;;  %128 = vrot.lane.b32.xlu1 %v56_v14, %s2305_s19 }
  0x18   :  { %138 = vrot.lane.b32.xlu0 %v63_v11, %s2306_s20  ;;  %140 = vrot.lane.b32.xlu1 %v67_v13, %s2306_s20 }
  0x1c   :  { %77 = vrot.lane.b32.xlu0 %v52_v12, %s2307_s21  ;;  %79 = vrot.lane.b32.xlu1 %v56_v14, %s2307_s21 }
  0x20   :  { %1876 = vrot.lane.b32.xlu0 %v1875_v15, %s2303_s18  ;;  %152 = vrot.lane.b32.xlu1 %v2409_v16, %s2303_s18 }
  0x24   :  { %1881 = vrot.lane.b32.xlu0 %v1875_v15, %s2307_s21 }
  0x7a   :  { %v2415_v17 = vpop.permute.xlu0 %89  ;;  %v2417_v18 = vpop.permute.xlu1 %101 }
  0x7b   :  { %v110_v19 = vmul.f32 %v2417_v18, %v2409_v16  ;;  %v98_v20 = vmul.f32 %v2415_v17, %v2409_v16 }
  0x7d   :  { %175 = vrot.lane.b32.xlu1 %v110_v19, %s2308_s22  ;;  %163 = vrot.lane.b32.xlu0 %v98_v20, %s2309_s23 }
  0x7e   :  { %v2425_v21 = vpop.permute.xlu0 %91  ;;  %v2427_v22 = vpop.permute.xlu1 %103 }
  0x7f   :  { %v2432_v23 = vsel %vm105_vm2, %v2417_v18, %v2427_v22  ;;  %v112_v24 = vmul.f32 %v2427_v22, %v2386_v5  ;;  %v2440_v27 = vsel %vm93_vm3, %v2415_v17, %v2425_v21  ;;  %v100_v31 = vmul.f32 %v2425_v21, %v2386_v5 }
  0x80   :  { %v111_v26 = vmul.f32 %v2432_v23, %v2381_v4  ;;  %v99_v35 = vmul.f32 %v2440_v27, %v2381_v4  ;;  %vm726_vm3 = vcmask 64512  }
  0x81   :  { %1891 = vrot.lane.b32.xlu1 %v1875_v15, %s2310_s24 }
  0x82   :  { %v2443_v28 = vpop.permute.xlu0 %114  ;;  %v2445_v29 = vpop.permute.xlu1 %116  ;;  %v1895_v30 = vpack.i.bf16 %v112_v24, %v111_v26  ;;  %v1885_v40 = vpack.i.bf16 %v100_v31, %v99_v35 }
  0x83   :  { %v125_v32 = vmul.f32 %v2445_v29, %v113_v25  ;;  %v2452_v33 = vsel %vm118_vm4, %v2443_v28, %v2445_v29  ;;  %v123_v34 = vmul.f32 %v2443_v28, %v2381_v4 }
  0x84   :  { %v124_v36 = vmul.f32 %v2452_v33, %v2386_v5 }
  0x85   :  { %196 = vrot.lane.b32.xlu0 %v125_v32, %s2311_s25  ;;  %1896 = vrot.lane.b32.xlu1 %v1895_v30, %s2308_s22 }
  0x86   :  { %v2462_v37 = vpop.permute.xlu0 %126  ;;  %v2464_v38 = vpop.permute.xlu1 %128  ;;  %v1900_v39 = vpack.i.bf16 %v124_v36, %v123_v34 }
  0x87   :  { %v2468_v41 = vsel %vm130_vm5, %v2462_v37, %v2464_v38  ;;  %v135_v42 = vmul.f32 %v2462_v37, %v2381_v4  ;;  %v137_v44 = vmul.f32 %v2464_v38, %v113_v25  ;;  %vm823_vm5 = vcmask 1041408  }
  0x88   :  { %v136_v43 = vmul.f32 %v2468_v41, %v2386_v5 }
  0x89   :  { %1901 = vrot.lane.b32.xlu1 %v1900_v39, %s2311_s25  ;;  %1886 = vrot.lane.b32.xlu0 %v1885_v40, %s2309_s23 }
  0x8a   :  { %v1905_v45 = vpack.i.bf16 %v136_v43, %v135_v42  ;;  %v2477_v46 = vpop.permute.xlu0 %138  ;;  %v2479_v47 = vpop.permute.xlu1 %140 }
  0x8b   :  { %v146_v48 = vmul.f32 %v2477_v46, %v2381_v4  ;;  %v2488_v49 = vsel %vm32_vm1, %v2477_v46, %v2479_v47  ;;  %v148_v53 = vmul.f32 %v2479_v47, %v113_v25 }
  0x8c   :  { %v147_v54 = vmul.f32 %v2488_v49, %v2386_v5 }
  0x8d   :  { %1906 = vrot.lane.b32.xlu1 %v1905_v45, %s2312_s26  ;;  %208 = vrot.lane.b32.xlu0 %v137_v44, %s2312_s26 }
  0x8e   :  { %v2490_v50 = vpop.permute.xlu0 %77  ;;  %v2492_v51 = vpop.permute.xlu1 %79 }
  0x8f   :  { %v2497_v52 = vsel %vm81_vm6, %v2490_v50, %v2492_v51  ;;  %v88_v56 = vmul.f32 %v2492_v51, %v2386_v5  ;;  %v86_v61 = vmul.f32 %v2490_v50, %v2409_v16 }
  0x90   :  { %v87_v55 = vmul.f32 %v2497_v52, %v2381_v4 }
  0x91   :  { %218 = vrot.lane.b32.xlu0 %v113_v25, %s2310_s24  ;;  %226 = vrot.lane.b32.xlu1 %v146_v48, %s2313_s27 }
  0x92   :  { %v1877_v57 = vpop.permute.xlu0 %1876  ;;  %v153_v60 = vpop.permute.xlu1 %152  ;;  %v1910_v62 = vpack.i.bf16 %v88_v56, %v87_v55 }
  0x93   :  { %v1879_v58 = vunpack.i.h.bf16 %v1877_v57  ;;  %v1878_v59 = vunpack.i.l.bf16 %v1877_v57 }
  0x95   :  { %228 = vrot.lane.b32.xlu0 %v147_v54, %s2313_s27  ;;  %230 = vrot.lane.b32.xlu1 %v148_v53, %s2313_s27  ;;  %v159_v63 = vsel %vm105_vm2, %v1878_v59, %v1879_v58  ;;  %v158_v0 = vsel %vm105_vm2, %v153_v60, %v1878_v59 }
  0x96   :  { %v1915_v2 = vpack.i.bf16 %v1879_v58, %v159_v63  ;;  %v1882_v3 = vpop.permute.xlu0 %1881  ;;  %v1920_v9 = vpack.i.bf16 %v158_v0, %v86_v61 }
  0x97   :  { %v1884_v4 = vunpack.i.h.bf16 %v1882_v3  ;;  %v1883_v5 = vunpack.i.l.bf16 %v1882_v3 }
  0x99   :  { %1911 = vrot.lane.b32.xlu0 %v1910_v62, %s2306_s20  ;;  %1916 = vrot.lane.b32.xlu1 %v1915_v2, %s2306_s20  ;;  %v188_v10 = vsel %vm81_vm6, %v1883_v5, %v1884_v4 }
  0x9a   :  { %v1925_v11 = vpack.i.bf16 %v1884_v4, %v188_v10 }
  0x9d   :  { %1921 = vrot.lane.b32.xlu0 %v1920_v9, %s2306_s20 }
  0xa1   :  { %1926 = vrot.lane.b32.xlu0 %v1925_v11, %s2306_s20 }
  0xef   :  { %v176_v12 = vpop.permute.xlu1 %175  ;;  %v164_v13 = vpop.permute.xlu0 %163 }
  0xf3   :  { %v2519_v14 = vpop.permute.xlu1 %1891 }
  0xf4   :  { %v1894_v39 = vunpack.i.h.bf16 %v2519_v14  ;;  %v1893_v40 = vunpack.i.l.bf16 %v2519_v14 }
  0xf6   :  { %v221_v54 = vsel %vm220_vm9, %v1893_v40, %v1894_v39 }
  0xf7   :  { %v197_v15 = vpop.permute.xlu0 %196  ;;  %v1897_v16 = vpop.permute.xlu1 %1896 }
  0xf8   :  { %v1899_v19 = vunpack.i.h.bf16 %v1897_v16  ;;  %v1898_v20 = vunpack.i.l.bf16 %v1897_v16 }
  0xfa   :  { %v183_v24 = vsel %vm181_vm7, %v1898_v20, %v1899_v19  ;;  %v182_v53 = vsel %vm181_vm7, %v176_v12, %v1898_v20 }
  0xfb   :  { %v1902_v25 = vpop.permute.xlu1 %1901  ;;  %v1887_v26 = vpop.permute.xlu0 %1886  ;;  %v1935_v30 = vpack.i.bf16 %v1899_v19, %v183_v24 }
  0xfc   :  { %v1903_v31 = vunpack.i.l.bf16 %v1902_v25  ;;  %v1889_v32 = vunpack.i.h.bf16 %v1887_v26  ;;  %v1888_v34 = vunpack.i.l.bf16 %v1887_v26  ;;  %v1904_v45 = vunpack.i.h.bf16 %v1902_v25  ;;  %v2545_v26 = vld [vmem:[#allocation3] sm:$0xff] }
  0xfd   :  { %1936 = vrot.lane.b32.xlu0 %v1935_v30, %s2306_s20 }
  0xfe   :  { %v171_v35 = vsel %vm169_vm8, %v1888_v34, %v1889_v32  ;;  %v1940_v36 = vpack.i.bf16 %v1903_v31, %v1883_v5  ;;  %v170_v48 = vsel %vm169_vm8, %v164_v13, %v1888_v34  ;;  %v199_v60 = vsel %vm198_vm10, %v1903_v31, %v1904_v45 }
  0xff   :  { %v1907_v42 = vpop.permute.xlu1 %1906  ;;  %v209_v43 = vpop.permute.xlu0 %208  ;;  %v1930_v44 = vpack.i.bf16 %v1889_v32, %v171_v35  ;;  %v1950_v56 = vpack.i.bf16 %v182_v53, %v170_v48  ;;  %v200_v61 = vsel %vm198_vm10, %v1904_v45, %v197_v15  ;;  %v454_v32 = vmul.f32 %v2545_v26, %v2415_v17  ;;  %v2551_v35 = vld [vmem:[#allocation3 + $0x18] sm:$0xff] }
 0x100   :  { %v1909_v58 = vunpack.i.h.bf16 %v1907_v42  ;;  %v1908_v63 = vunpack.i.l.bf16 %v1907_v42  ;;  %v1955_v2 = vpack.i.bf16 %v200_v61, %v199_v60  ;;  %v463_v42 = vmul.f32 %v2551_v35, %v2445_v29 }
 0x101   :  { %1931 = vrot.lane.b32.xlu1 %v1930_v44, %s2306_s20  ;;  %1941 = vrot.lane.b32.xlu0 %v1940_v36, %s2306_s20  ;;  %v457_v44 = vmul.f32 %v2545_v26, %v2417_v18 }
 0x102   :  { %v211_v4 = vsel %vm210_vm11, %v1908_v63, %v1909_v58  ;;  %v212_v5 = vsel %vm210_vm11, %v1909_v58, %v209_v43  ;;  %v1965_v20 = vpack.i.bf16 %v1893_v40, %v1908_v63  ;;  %v70_v43 = vld [vmem:[%s2966_s2] sm:$0xff] }
 0x103   :  { %v219_v55 = vpop.permute.xlu0 %218  ;;  %v227_v57 = vpop.permute.xlu1 %226  ;;  %v1960_v9 = vpack.i.bf16 %v212_v5, %v211_v4 }
 0x104   :  { %v222_v59 = vsel %vm220_vm9, %v1894_v39, %v219_v55 }
 0x105   :  { %v1945_v62 = vpack.i.bf16 %v222_v59, %v221_v54  ;;  %1951 = vrot.lane.b32.xlu1 %v1950_v56, %s2306_s20 }
 0x107   :  { %1946 = vrot.lane.b32.xlu0 %v1945_v62, %s2306_s20  ;;  %v229_v0 = vpop.permute.xlu0 %228  ;;  %v231_v3 = vpop.permute.xlu1 %230 }
 0x108   :  { %v233_v6 = vsel %vm232_vm12, %v227_v57, %v229_v0  ;;  %v234_v34 = vsel %vm232_vm12, %v229_v0, %v231_v3 }
 0x109   :  { %1956 = vrot.lane.b32.xlu1 %v1955_v2, %s2306_s20 }
 0x10b   :  { %293 = vrot.lane.b32.xlu0 %v233_v6, %s2306_s20  ;;  %v1912_v10 = vpop.permute.xlu0 %1911  ;;  %v1917_v11 = vpop.permute.xlu1 %1916 }
 0x10c   :  { %v1914_v12 = vunpack.i.h.bf16 %v1912_v10  ;;  %v1913_v13 = vunpack.i.l.bf16 %v1912_v10  ;;  %v1919_v14 = vunpack.i.h.bf16 %v1917_v11  ;;  %v1918_v15 = vunpack.i.l.bf16 %v1917_v11 }
 0x10d   :  { %1961 = vrot.lane.b32.xlu1 %v1960_v9, %s2306_s20 }
 0x10e   :  { %v298_v16 = vsel %vm32_vm1, %v1913_v13, %v1914_v12  ;;  %v300_v19 = vsel %vm32_vm1, %v1918_v15, %v1919_v14 }
 0x10f   :  { %291 = vrot.lane.b32.xlu0 %v227_v57, %s2306_s20  ;;  %v1922_v24 = vpop.permute.xlu0 %1921  ;;  %v1796_v25 = vpack.c.bf16 %v300_v19, %v298_v16 }
 0x110   :  { %v1924_v30 = vunpack.i.h.bf16 %v1922_v24  ;;  %v1923_v31 = vunpack.i.l.bf16 %v1922_v24 }
 0x111   :  { %1966 = vrot.lane.b32.xlu1 %v1965_v20, %s2306_s20  ;;  %1797 = vmatprep.subr.bf16.mxu0 %v1796_v25 }
 0x112   :  { %v297_v36 = vsel %vm32_vm1, %v1923_v31, %v1913_v13  ;;  %v299_v39 = vsel %vm32_vm1, %v1924_v30, %v1918_v15 }
 0x113   :  { %484 = vrot.lane.b32.xlu0 %v454_v32, %s2309_s23  ;;  %v1798_v40 = vpack.c.bf16 %v299_v39, %v297_v36  ;;  %v1927_v45 = vpop.permute.xlu0 %1926 }
 0x114   :  { %v1929_v2 = vunpack.i.h.bf16 %v1927_v45  ;;  %v1928_v3 = vunpack.i.l.bf16 %v1927_v45 }
 0x115   :  { %295 = vrot.lane.b32.xlu1 %v234_v34, %s2306_s20  ;;  %1799 = vmatpush1.bf16.msra.mxu0 %v1798_v40 }
 0x116   :  { %v306_v15 = vsel %vm32_vm1, %v1928_v3, %v1929_v2 }
 0x117   :  { %515 = vrot.lane.b32.xlu0 %v463_v42, %s2311_s25 }
 0x119   :  { %237 = vperm.xlu1 %1970, %v70_v43  }
 0x11d   :  { %473 = vrot.lane.b32.xlu1 %v2545_v26, %s2303_s18 }
 0x121   :  { %495 = vrot.lane.b32.xlu1 %v457_v44, %s2308_s22 }
 0x16f   :  { %v1937_v48 = vpop.permute.xlu0 %1936 }
 0x170   :  { %v1939_v53 = vunpack.i.h.bf16 %v1937_v48  ;;  %v1938_v54 = vunpack.i.l.bf16 %v1937_v48 }
 0x172   :  { %v304_v60 = vsel %vm32_vm1, %v1938_v54, %v1939_v53 }
 0x173   :  { %v1932_v55 = vpop.permute.xlu1 %1931  ;;  %v1942_v58 = vpop.permute.xlu0 %1941 }
 0x174   :  { %v1934_v56 = vunpack.i.h.bf16 %v1932_v55  ;;  %v1933_v57 = vunpack.i.l.bf16 %v1932_v55  ;;  %v1943_v4 = vunpack.i.l.bf16 %v1942_v58  ;;  %v1944_v12 = vunpack.i.h.bf16 %v1942_v58 }
 0x176   :  { %v302_v59 = vsel %vm32_vm1, %v1933_v57, %v1934_v56  ;;  %v305_v16 = vsel %vm32_vm1, %v1943_v4, %v1928_v3 }
 0x177   :  { %v1952_v61 = vpop.permute.xlu1 %1951  ;;  %v1800_v62 = vpack.c.bf16 %v304_v60, %v302_v59  ;;  %v2584_v59 = vld [vmem:[%s2967_s1] sm:$0xff] }
 0x178   :  { %v1954_v63 = vunpack.i.h.bf16 %v1952_v61  ;;  %v1953_v0 = vunpack.i.l.bf16 %v1952_v61 }
 0x179   :  { %1801 = vmatprep.subr.bf16.mxu0 %v1800_v62  ;;  %v1947_v9 = vpop.permute.xlu0 %1946 }
 0x17a   :  { %v301_v5 = vsel %vm32_vm1, %v1953_v0, %v1933_v57  ;;  %v303_v6 = vsel %vm32_vm1, %v1954_v63, %v1938_v54  ;;  %v1949_v19 = vunpack.i.h.bf16 %v1947_v9  ;;  %v1948_v20 = vunpack.i.l.bf16 %v1947_v9 }
 0x17b   :  { %v1957_v10 = vpop.permute.xlu1 %1956  ;;  %v1802_v11 = vpack.c.bf16 %v303_v6, %v301_v5 }
 0x17c   :  { %v1959_v13 = vunpack.i.h.bf16 %v1957_v10  ;;  %v1958_v14 = vunpack.i.l.bf16 %v1957_v10  ;;  %v312_v40 = vsel %vm32_vm1, %v1948_v20, %v1949_v19 }
 0x17d   :  { %1803 = vmatpush1.bf16.msra.mxu0 %v1802_v11  ;;  %v294_v48 = vpop.permute.xlu0 %293 }
 0x17e   :  { %v308_v24 = vsel %vm32_vm1, %v1958_v14, %v1959_v13  ;;  %v307_v25 = vsel %vm32_vm1, %v1944_v12, %v1958_v14 }
 0x17f   :  { %v1962_v30 = vpop.permute.xlu1 %1961  ;;  %v1804_v31 = vpack.c.bf16 %v308_v24, %v306_v15  ;;  %v1806_v32 = vpack.c.bf16 %v307_v25, %v305_v16 }
 0x180   :  { %v1964_v34 = vunpack.i.h.bf16 %v1962_v30  ;;  %v1963_v36 = vunpack.i.l.bf16 %v1962_v30 }
 0x181   :  { %1805 = vmatprep.subr.bf16.mxu0 %v1804_v31  ;;  %v292_v58 = vpop.permute.xlu0 %291 }
 0x182   :  { %1807 = vmatpush1.bf16.msra.mxu0 %v1806_v32  ;;  %v310_v39 = vsel %vm32_vm1, %v1963_v36, %v1964_v34  ;;  %v313_v60 = vsel %vm32_vm1, %v292_v58, %v294_v48 }
 0x183   :  { %v1967_v42 = vpop.permute.xlu1 %1966  ;;  %v1808_v43 = vpack.c.bf16 %v312_v40, %v310_v39 }
 0x184   :  { %v1969_v44 = vunpack.i.h.bf16 %v1967_v42  ;;  %v1968_v45 = vunpack.i.l.bf16 %v1967_v42 }
 0x185   :  { %1809 = vmatprep.subr.bf16.mxu0 %v1808_v43 }
 0x186   :  { %v309_v53 = vsel %vm32_vm1, %v1968_v45, %v1963_v36  ;;  %v311_v54 = vsel %vm32_vm1, %v1969_v44, %v1948_v20 }
 0x187   :  { %v296_v55 = vpop.permute.xlu1 %295  ;;  %v1810_v56 = vpack.c.bf16 %v311_v54, %v309_v53 }
 0x188   :  { %v314_v57 = vsel %vm32_vm1, %v294_v48, %v296_v55 }
 0x189   :  { %1811 = vmatpush1.bf16.msra.mxu0 %v1810_v56 }
 0x18a   :  { %353 = vmatprep.subr.mxu0 %v314_v57 }
 0x18d   :  { %354 = vmatpush1.msra.mxu0 %v313_v60 }
 0x18e   :  { %1754 = vmatmul.mubr.msk.f32.vlgmr.msra.gmra.mrb[0].mxu0 %vm333_vm13, %v2584_v59  ;;  %1776 = vmatprep.subr.mxu0 %v2301_v1 }
 0x18f   :  { %1778 = vmatprep.mubr.msk.f32.mxu0 %vm2315_vm0, %v2301_v1 }
 0x198   :  { %v2590_v61 = vpop.permute.xlu1 %237 }
 0x261   :  { %v403_v62 = vpop.f32.mrb[0].mxu0 }
 0x262   :  { %v404_v63 = vadd.f32 %v403_v62, %v2590_v61  ;;  %v405_v0 = vpop.f32.mrb[1].mxu0 }
 0x263   :  { %v406_v2 = vadd.f32 %v405_v0, %v2590_v61 }
 0x264   :  { %v408_v3 = vand.u32 2147483647, %v404_v63  ;;  %vm418_vm14 = vcmp.ge.f32.partialorder %v404_v63, 0.0 }
 0x265   :  { %v409_v4 = vand.u32 2147483647, %v406_v2  ;;  %vm419_vm15 = vcmp.ge.f32.partialorder %v406_v2, 0.0 }
 0x266   :  { %v410_v5 = vsub.f32 0.0, %v408_v3 }
 0x267   :  { %v411_v6 = vsub.f32 0.0, %v409_v4 }
 0x268   :  { %v412_v9 = vmul.f32 1.442695, %v410_v5 }
 0x269   :  { %v414_v10 = vmul.f32 1.442695, %v411_v6 }
 0x26a   :  { %2257 = vpow2.f32 %v412_v9 }
 0x26b   :  { %2259 = vpow2.f32 %v414_v10 }
 0x274   :  { %v2258_v11 = vpop.eup %2257 }
 0x275   :  { %v2260_v12 = vpop.eup %2259  ;;  %v416_v13 = vmul.f32 %v2258_v11, %v2258_v11  ;;  %v420_v14 = vmul.f32 2.0, %v2258_v11 }
 0x276   :  { %v417_v15 = vmul.f32 %v2260_v12, %v2260_v12  ;;  %v421_v16 = vmul.f32 2.0, %v2260_v12 }
 0x277   :  { %v422_v19 = vadd.f32 1.0, %v420_v14  ;;  %v424_v20 = vadd.f32 %v420_v14, %v416_v13  ;;  %v428_v24 = vmul.f32 2.0, %v416_v13 }
 0x278   :  { %v423_v25 = vadd.f32 1.0, %v421_v16  ;;  %v425_v30 = vadd.f32 %v421_v16, %v417_v15  ;;  %v429_v31 = vmul.f32 2.0, %v417_v15 }
 0x279   :  { %v426_v32 = vsel %vm418_vm14, %v422_v19, %v424_v20  ;;  %v430_v34 = vsel %vm418_vm14, %v428_v24, 2.0  ;;  %v466_v20 = vmul.f32 %v2551_v35, %v2464_v38  ;;  %vm819_vm14 = vcmask 15360  }
 0x27a   :  { %v432_v36 = vadd.f32 %v430_v34, %v426_v32  ;;  %v427_v39 = vsel %vm419_vm15, %v423_v25, %v425_v30  ;;  %v431_v40 = vsel %vm419_vm15, %v429_v31, 2.0  ;;  %v442_v56 = vmul.f32 %v426_v32, %v404_v63  ;;  %v485_v31 = vpop.permute.xlu0 %484  ;;  %v474_v32 = vpop.permute.xlu1 %473 }
 0x27b   :  { %v433_v42 = vadd.f32 %v431_v40, %v427_v39  ;;  %v443_v58 = vmul.f32 %v427_v39, %v406_v2  ;;  %v469_v25 = vmul.f32 %v2551_v35, %v2479_v47 }
 0x27c   :  { %2261 = vrcp.f32 %v432_v36 }
 0x27d   :  { %2263 = vrcp.f32 %v433_v42 }
 0x27e   :  { %v516_v34 = vpop.permute.xlu0 %515 }
 0x286   :  { %v2262_v43 = vpop.eup %2261 }
 0x287   :  { %v2264_v44 = vpop.eup %2263  ;;  %v436_v45 = vmul.f32 %v2262_v43, %v432_v36  ;;  %v496_v36 = vpop.permute.xlu1 %495 }
 0x288   :  { %v437_v48 = vmul.f32 %v2264_v44, %v433_v42 }
 0x289   :  { %v438_v53 = vsub.f32 2.0, %v436_v45 }
 0x28a   :  { %v439_v54 = vsub.f32 2.0, %v437_v48 }
 0x28b   :  { %v440_v55 = vmul.f32 %v2262_v43, %v438_v53 }
 0x28c   :  { %v441_v57 = vmul.f32 %v2264_v44, %v439_v54  ;;  %v451_v44 = vmul.f32 %v2545_v26, %v2490_v50 }
 0x28d   :  { %v444_v60 = vmul.f32 %v442_v56, %v440_v55 }
 0x28e   :  { %v445_v62 = vmul.f32 %v443_v58, %v441_v57 }
 0x28f   :  { %v458_v0 = vmul.f32 %v444_v60, %v2432_v23  ;;  %v461_v3 = vmul.f32 %v444_v60, %v2443_v28  ;;  %v455_v4 = vmul.f32 %v444_v60, %v2440_v27  ;;  %v464_v5 = vmul.f32 %v444_v60, %v2462_v37 }
 0x290   :  { %v1986_v6 = vpack.i.bf16 %v445_v62, %v444_v60  ;;  %v459_v9 = vmul.f32 %v445_v62, %v2427_v22  ;;  %v462_v10 = vmul.f32 %v445_v62, %v2452_v33  ;;  %v456_v11 = vmul.f32 %v445_v62, %v2425_v21 }
 0x291   :  { %v465_v63 = vmul.f32 %v445_v62, %v2468_v41  ;;  %v452_v2 = vmul.f32 %v444_v60, %v2497_v52  ;;  %v453_v16 = vmul.f32 %v445_v62, %v2492_v51  ;;  %v467_v24 = vmul.f32 %v444_v60, %v2477_v46 }
 0x292   :  { %1987 = vrot.lane.b32.xlu1 %v1986_v6, %s2310_s24  ;;  %1972 = vrot.lane.b32.xlu0 %v1986_v6, %s2303_s18  ;;  %v1991_v12 = vpack.i.bf16 %v459_v9, %v458_v0  ;;  %v1996_v13 = vpack.i.bf16 %v462_v10, %v461_v3  ;;  %v1981_v14 = vpack.i.bf16 %v456_v11, %v455_v4 }
 0x293   :  { %v2001_v15 = vpack.i.bf16 %v465_v63, %v464_v5  ;;  %v2006_v19 = vpack.i.bf16 %v453_v16, %v452_v2  ;;  %v468_v30 = vmul.f32 %v445_v62, %v2488_v49 }
 0x296   :  { %1977 = vrot.lane.b32.xlu0 %v1986_v6, %s2307_s21  ;;  %1992 = vrot.lane.b32.xlu1 %v1991_v12, %s2308_s22 }
 0x29a   :  { %1997 = vrot.lane.b32.xlu1 %v1996_v13, %s2311_s25  ;;  %1982 = vrot.lane.b32.xlu0 %v1981_v14, %s2309_s23 }
 0x29e   :  { %2002 = vrot.lane.b32.xlu1 %v2001_v15, %s2312_s26  ;;  %526 = vrot.lane.b32.xlu0 %v466_v20, %s2312_s26 }
 0x2a2   :  { %542 = vrot.lane.b32.xlu1 %v467_v24, %s2313_s27  ;;  %535 = vrot.lane.b32.xlu0 %v2551_v35, %s2310_s24 }
 0x2a6   :  { %546 = vrot.lane.b32.xlu1 %v469_v25, %s2313_s27  ;;  %544 = vrot.lane.b32.xlu0 %v468_v30, %s2313_s27 }
 0x2aa   :  { %2007 = vrot.lane.b32.xlu0 %v2006_v19, %s2306_s20 }
 0x304   :  { %v1988_v39 = vpop.permute.xlu1 %1987  ;;  %v1973_v40 = vpop.permute.xlu0 %1972 }
 0x305   :  { %v1975_v42 = vunpack.i.h.bf16 %v1973_v40  ;;  %v1974_v43 = vunpack.i.l.bf16 %v1973_v40  ;;  %v1990_v16 = vunpack.i.h.bf16 %v1988_v39  ;;  %v1989_v19 = vunpack.i.l.bf16 %v1988_v39 }
 0x307   :  { %v480_v35 = vsel %vm105_vm2, %v1974_v43, %v1975_v42  ;;  %v479_v45 = vsel %vm105_vm2, %v474_v32, %v1974_v43 }
 0x308   :  { %v2016_v48 = vpack.i.bf16 %v1975_v42, %v480_v35  ;;  %v1978_v53 = vpop.permute.xlu0 %1977  ;;  %v1993_v54 = vpop.permute.xlu1 %1992  ;;  %v2011_v55 = vpack.i.bf16 %v479_v45, %v451_v44  ;;  %v537_v42 = vsel %vm220_vm9, %v1989_v19, %v1990_v16 }
 0x309   :  { %v1980_v56 = vunpack.i.h.bf16 %v1978_v53  ;;  %v1979_v57 = vunpack.i.l.bf16 %v1978_v53  ;;  %v1995_v58 = vunpack.i.h.bf16 %v1993_v54  ;;  %v1994_v60 = vunpack.i.l.bf16 %v1993_v54 }
 0x30a   :  { %2017 = vrot.lane.b32.xlu1 %v2016_v48, %s2306_s20  ;;  %2012 = vrot.lane.b32.xlu0 %v2011_v55, %s2306_s20 }
 0x30b   :  { %v507_v62 = vsel %vm81_vm6, %v1979_v57, %v1980_v56  ;;  %v502_v6 = vsel %vm181_vm7, %v1994_v60, %v1995_v58  ;;  %v501_v10 = vsel %vm181_vm7, %v496_v36, %v1994_v60 }
 0x30c   :  { %v2021_v0 = vpack.i.bf16 %v1980_v56, %v507_v62  ;;  %v1998_v26 = vpop.permute.xlu1 %1997  ;;  %v1983_v3 = vpop.permute.xlu0 %1982  ;;  %v2036_v13 = vpack.i.bf16 %v1995_v58, %v502_v6  ;;  %v2066_v56 = vpack.i.bf16 %v2399_v8, %v2394_v7  ;;  %v961_v58 = vmul.f32 %v2425_v21, %v2399_v8  ;;  %v71_v62 = vld [vmem:[%s2968_s4] sm:$0xff] }
 0x30d   :  { %v1985_v4 = vunpack.i.h.bf16 %v1983_v3  ;;  %v1984_v5 = vunpack.i.l.bf16 %v1983_v3  ;;  %v2000_v11 = vunpack.i.h.bf16 %v1998_v26  ;;  %v1999_v63 = vunpack.i.l.bf16 %v1998_v26  ;;  %v2666_v26 = vld [vmem:[#allocation2 + $0x20] sm:$0xff] }
 0x30e   :  { %2022 = vrot.lane.b32.xlu0 %v2021_v0, %s2306_s20  ;;  %v959_v3 = vmul.f32 %v2666_v26, %v2415_v17 }
 0x30f   :  { %v490_v9 = vsel %vm169_vm8, %v485_v31, %v1984_v5  ;;  %v491_v14 = vsel %vm169_vm8, %v1984_v5, %v1985_v4  ;;  %v2041_v25 = vpack.i.bf16 %v1999_v63, %v1979_v57  ;;  %v517_v30 = vsel %vm198_vm10, %v1999_v63, %v2000_v11 }
 0x310   :  { %v527_v2 = vpop.permute.xlu0 %526  ;;  %v2026_v12 = vpack.i.bf16 %v501_v10, %v490_v9  ;;  %v2003_v15 = vpop.permute.xlu1 %2002  ;;  %v2031_v20 = vpack.i.bf16 %v1985_v4, %v491_v14  ;;  %v518_v40 = vsel %vm198_vm10, %v2000_v11, %v516_v34  ;;  %v960_v57 = vmul.f32 %v2440_v27, %v2394_v7  ;;  %v965_v9 = vld [vmem:[#allocation2 + $0x38] sm:$0xff] }
 0x311   :  { %v2005_v31 = vunpack.i.h.bf16 %v2003_v15  ;;  %v2004_v32 = vunpack.i.l.bf16 %v2003_v15  ;;  %v2051_v44 = vpack.i.bf16 %v518_v40, %v517_v30  ;;  %v963_v4 = vmul.f32 %v2432_v23, %v2394_v7 }
 0x312   :  { %2027 = vrot.lane.b32.xlu1 %v2026_v12, %s2306_s20  ;;  %2037 = vrot.lane.b32.xlu0 %v2036_v13, %s2306_s20  ;;  %v2071_v0 = vpack.i.bf16 %v961_v58, %v960_v57  ;;  %v964_v5 = vmul.f32 %v2427_v22, %v2399_v8  ;;  %v962_v10 = vmul.f32 %v2666_v26, %v2417_v18 }
 0x313   :  { %v528_v39 = vsel %vm210_vm11, %v2004_v32, %v2005_v31  ;;  %v529_v35 = vsel %vm210_vm11, %v2005_v31, %v527_v2  ;;  %v2061_v54 = vpack.i.bf16 %v1989_v19, %v2004_v32  ;;  %v968_v11 = vmul.f32 %v965_v9, %v2445_v29 }
 0x314   :  { %v536_v24 = vpop.permute.xlu0 %535  ;;  %v2056_v48 = vpack.i.bf16 %v529_v35, %v528_v39  ;;  %v543_v53 = vpop.permute.xlu1 %542  ;;  %v2076_v6 = vpack.i.bf16 %v964_v5, %v963_v4  ;;  %v966_v63 = vmul.f32 %v2443_v28, %v2394_v7  ;;  %v967_v2 = vmul.f32 %v2452_v33, %v2399_v8 }
 0x315   :  { %v538_v36 = vsel %vm220_vm9, %v1990_v16, %v536_v24  ;;  %v971_v13 = vmul.f32 %v965_v9, %v2464_v38  ;;  %v969_v14 = vmul.f32 %v2462_v37, %v2394_v7  ;;  %v970_v15 = vmul.f32 %v2468_v41, %v2399_v8 }
 0x316   :  { %2032 = vrot.lane.b32.xlu1 %v2031_v20, %s2306_s20  ;;  %2042 = vrot.lane.b32.xlu0 %v2041_v25, %s2306_s20  ;;  %v2046_v43 = vpack.i.bf16 %v538_v36, %v537_v42  ;;  %v2086_v12 = vpack.i.bf16 %v967_v2, %v966_v63  ;;  %v973_v19 = vmul.f32 %v2488_v49, %v2399_v8 }
 0x317   :  { %v2091_v16 = vpack.i.bf16 %v970_v15, %v969_v14  ;;  %v972_v20 = vmul.f32 %v2477_v46, %v2394_v7  ;;  %v974_v24 = vmul.f32 %v965_v9, %v2479_v47  ;;  %v957_v25 = vmul.f32 %v2497_v52, %v2394_v7 }
 0x318   :  { %v545_v45 = vpop.permute.xlu0 %544  ;;  %v547_v55 = vpop.permute.xlu1 %546  ;;  %v958_v30 = vmul.f32 %v2492_v51, %v2399_v8 }
 0x319   :  { %v548_v34 = vsel %vm232_vm12, %v543_v53, %v545_v45  ;;  %v549_v60 = vsel %vm232_vm12, %v545_v45, %v547_v55 }
 0x31a   :  { %2052 = vrot.lane.b32.xlu1 %v2051_v44, %s2306_s20  ;;  %2047 = vrot.lane.b32.xlu0 %v2046_v43, %s2306_s20  ;;  %v2101_v31 = vpack.i.bf16 %v958_v30, %v957_v25 }
 0x31c   :  { %v2008_v32 = vpop.permute.xlu0 %2007 }
 0x31d   :  { %v2010_v36 = vunpack.i.h.bf16 %v2008_v32  ;;  %v2009_v40 = vunpack.i.l.bf16 %v2008_v32 }
 0x31e   :  { %2057 = vrot.lane.b32.xlu1 %v2056_v48, %s2306_s20  ;;  %608 = vrot.lane.b32.xlu0 %v548_v34, %s2306_s20 }
 0x31f   :  { %v613_v48 = vsel %vm32_vm1, %v2009_v40, %v2010_v36 }
 0x322   :  { %2062 = vrot.lane.b32.xlu1 %v2061_v54, %s2306_s20  ;;  %606 = vrot.lane.b32.xlu0 %v543_v53, %s2306_s20 }
 0x326   :  { %610 = vrot.lane.b32.xlu1 %v549_v60, %s2306_s20  ;;  %2067 = vrot.lane.b32.xlu0 %v2066_v56, %s2303_s18 }
 0x32a   :  { %552 = vperm.xlu1 %1970, %v71_v62   ;;  %2072 = vrot.lane.b32.xlu0 %v2071_v0, %s2309_s23 }
 0x32e   :  { %978 = vrot.lane.b32.xlu1 %v2666_v26, %s2303_s18  ;;  %989 = vrot.lane.b32.xlu0 %v959_v3, %s2309_s23 }
 0x332   :  { %2077 = vrot.lane.b32.xlu1 %v2076_v6, %s2308_s22  ;;  %2082 = vrot.lane.b32.xlu0 %v2066_v56, %s2307_s21 }
 0x336   :  { %1000 = vrot.lane.b32.xlu1 %v962_v10, %s2308_s22  ;;  %1020 = vrot.lane.b32.xlu0 %v968_v11, %s2311_s25 }
 0x33a   :  { %2087 = vrot.lane.b32.xlu1 %v2086_v12, %s2311_s25  ;;  %1031 = vrot.lane.b32.xlu0 %v971_v13, %s2312_s26 }
 0x33e   :  { %2092 = vrot.lane.b32.xlu1 %v2091_v16, %s2312_s26  ;;  %1040 = vrot.lane.b32.xlu0 %v965_v9, %s2310_s24 }
 0x342   :  { %2097 = vrot.lane.b32.xlu1 %v2066_v56, %s2310_s24  ;;  %1049 = vrot.lane.b32.xlu0 %v973_v19, %s2313_s27 }
 0x346   :  { %1047 = vrot.lane.b32.xlu1 %v972_v20, %s2313_s27 }
 0x34a   :  { %1051 = vrot.lane.b32.xlu1 %v974_v24, %s2313_s27 }
 0x34e   :  { %2102 = vrot.lane.b32.xlu1 %v2101_v31, %s2306_s20 }
 0x37c   :  { %v2018_v42 = vpop.permute.xlu1 %2017  ;;  %v2013_v43 = vpop.permute.xlu0 %2012 }
 0x37d   :  { %v2020_v44 = vunpack.i.h.bf16 %v2018_v42  ;;  %v2019_v39 = vunpack.i.l.bf16 %v2018_v42  ;;  %v2015_v35 = vunpack.i.h.bf16 %v2013_v43  ;;  %v2014_v45 = vunpack.i.l.bf16 %v2013_v43 }
 0x37f   :  { %v615_v7 = vsel %vm32_vm1, %v2019_v39, %v2020_v44  ;;  %v612_v8 = vsel %vm32_vm1, %v2014_v45, %v2009_v40  ;;  %v614_v53 = vsel %vm32_vm1, %v2015_v35, %v2019_v39 }
 0x380   :  { %v2023_v34 = vpop.permute.xlu0 %2022  ;;  %v1812_v54 = vpack.c.bf16 %v615_v7, %v613_v48  ;;  %v1814_v55 = vpack.c.bf16 %v614_v53, %v612_v8 }
 0x381   :  { %v2025_v9 = vunpack.i.h.bf16 %v2023_v34  ;;  %v2024_v10 = vunpack.i.l.bf16 %v2023_v34 }
 0x382   :  { %1813 = vmatprep.subr.bf16.mxu1 %v1812_v54 }
 0x383   :  { %1815 = vmatpush1.bf16.msra.mxu1 %v1814_v55  ;;  %v621_v30 = vsel %vm32_vm1, %v2024_v10, %v2025_v9 }
 0x384   :  { %v2028_v56 = vpop.permute.xlu1 %2027  ;;  %v2038_v57 = vpop.permute.xlu0 %2037 }
 0x385   :  { %v2030_v58 = vunpack.i.h.bf16 %v2028_v56  ;;  %v2040_v60 = vunpack.i.h.bf16 %v2038_v57  ;;  %v2039_v62 = vunpack.i.l.bf16 %v2038_v57  ;;  %v2029_v4 = vunpack.i.l.bf16 %v2028_v56 }
 0x387   :  { %v619_v2 = vsel %vm32_vm1, %v2039_v62, %v2040_v60  ;;  %v618_v13 = vsel %vm32_vm1, %v2030_v58, %v2039_v62 }
 0x388   :  { %v2033_v0 = vpop.permute.xlu1 %2032  ;;  %v2043_v3 = vpop.permute.xlu0 %2042 }
 0x389   :  { %v2035_v5 = vunpack.i.h.bf16 %v2033_v0  ;;  %v2034_v6 = vunpack.i.l.bf16 %v2033_v0  ;;  %v2044_v11 = vunpack.i.l.bf16 %v2043_v3  ;;  %v2045_v20 = vunpack.i.h.bf16 %v2043_v3 }
 0x38b   :  { %v617_v63 = vsel %vm32_vm1, %v2034_v6, %v2035_v5  ;;  %v616_v12 = vsel %vm32_vm1, %v2029_v4, %v2034_v6  ;;  %v620_v31 = vsel %vm32_vm1, %v2044_v11, %v2024_v10  ;;  %v2732_v10 = vld [vmem:[%s2969_s3] sm:$0xff] }
 0x38c   :  { %v2053_v14 = vpop.permute.xlu1 %2052  ;;  %v2048_v15 = vpop.permute.xlu0 %2047  ;;  %v1816_v16 = vpack.c.bf16 %v619_v2, %v617_v63  ;;  %v1818_v19 = vpack.c.bf16 %v618_v13, %v616_v12 }
 0x38d   :  { %v2055_v24 = vunpack.i.h.bf16 %v2053_v14  ;;  %v2054_v25 = vunpack.i.l.bf16 %v2053_v14  ;;  %v2050_v32 = vunpack.i.h.bf16 %v2048_v15  ;;  %v2049_v36 = vunpack.i.l.bf16 %v2048_v15 }
 0x38e   :  { %1817 = vmatprep.subr.bf16.mxu1 %v1816_v16  ;;  %v956_v15 = vmul.f32 %v2666_v26, %v2490_v50 }
 0x38f   :  { %1819 = vmatpush1.bf16.msra.mxu1 %v1818_v19  ;;  %v623_v40 = vsel %vm32_vm1, %v2054_v25, %v2055_v24  ;;  %v622_v42 = vsel %vm32_vm1, %v2045_v20, %v2054_v25  ;;  %v627_v8 = vsel %vm32_vm1, %v2049_v36, %v2050_v32 }
 0x390   :  { %v2058_v43 = vpop.permute.xlu1 %2057  ;;  %v609_v44 = vpop.permute.xlu0 %608  ;;  %v1820_v39 = vpack.c.bf16 %v623_v40, %v621_v30  ;;  %v1822_v35 = vpack.c.bf16 %v622_v42, %v620_v31 }
 0x391   :  { %v2060_v45 = vunpack.i.h.bf16 %v2058_v43  ;;  %v2059_v48 = vunpack.i.l.bf16 %v2058_v43 }
 0x392   :  { %1821 = vmatprep.subr.bf16.mxu1 %v1820_v39 }
 0x393   :  { %1823 = vmatpush1.bf16.msra.mxu1 %v1822_v35  ;;  %v625_v7 = vsel %vm32_vm1, %v2059_v48, %v2060_v45 }
 0x394   :  { %v2063_v53 = vpop.permute.xlu1 %2062  ;;  %v607_v34 = vpop.permute.xlu0 %606  ;;  %v1824_v54 = vpack.c.bf16 %v627_v8, %v625_v7 }
 0x395   :  { %v2065_v55 = vunpack.i.h.bf16 %v2063_v53  ;;  %v2064_v56 = vunpack.i.l.bf16 %v2063_v53  ;;  %v628_v11 = vsel %vm32_vm1, %v607_v34, %v609_v44 }
 0x396   :  { %1825 = vmatprep.subr.bf16.mxu1 %v1824_v54 }
 0x397   :  { %v624_v57 = vsel %vm32_vm1, %v2064_v56, %v2059_v48  ;;  %v626_v58 = vsel %vm32_vm1, %v2065_v55, %v2049_v36 }
 0x398   :  { %v611_v60 = vpop.permute.xlu1 %610  ;;  %v2068_v62 = vpop.permute.xlu0 %2067  ;;  %v1826_v0 = vpack.c.bf16 %v626_v58, %v624_v57 }
 0x399   :  { %v2070_v3 = vunpack.i.h.bf16 %v2068_v62  ;;  %v2069_v4 = vunpack.i.l.bf16 %v2068_v62  ;;  %v629_v5 = vsel %vm32_vm1, %v609_v44, %v611_v60 }
 0x39a   :  { %1827 = vmatpush1.bf16.msra.mxu1 %v1826_v0 }
 0x39b   :  { %v985_v6 = vsel %vm105_vm2, %v2069_v4, %v2070_v3  ;;  %667 = vmatprep.subr.mxu1 %v629_v5 }
 0x39c   :  { %v2106_v9 = vpack.i.bf16 %v2070_v3, %v985_v6  ;;  %v2073_v63 = vpop.permute.xlu0 %2072 }
 0x39d   :  { %v2075_v12 = vunpack.i.h.bf16 %v2073_v63  ;;  %v2074_v13 = vunpack.i.l.bf16 %v2073_v63 }
 0x39e   :  { %2107 = vrot.lane.b32.xlu1 %v2106_v9, %s2306_s20  ;;  %668 = vmatpush1.msra.mxu1 %v628_v11 }
 0x39f   :  { %1755 = vmatmul.mubr.msk.f32.vlgmr.msra.gmra.mrb[0].mxu1 %vm333_vm13, %v2732_v10  ;;  %1781 = vmatprep.subr.mxu1 %v2301_v1  ;;  %v996_v24 = vsel %vm169_vm8, %v2074_v13, %v2075_v12 }
 0x3a0   :  { %v990_v14 = vpop.permute.xlu0 %989  ;;  %v2116_v32 = vpack.i.bf16 %v2075_v12, %v996_v24  ;;  %1783 = vmatprep.mubr.msk.f32.mxu1 %vm2315_vm0, %v2301_v1 }
 0x3a1   :  { %v995_v48 = vsel %vm169_vm8, %v990_v14, %v2074_v13 }
 0x3a4   :  { %v2083_v36 = vpop.permute.xlu0 %2082 }
 0x3a5   :  { %v2085_v43 = vunpack.i.h.bf16 %v2083_v36  ;;  %v2084_v44 = vunpack.i.l.bf16 %v2083_v36 }
 0x3a7   :  { %v1012_v7 = vsel %vm81_vm6, %v2084_v44, %v2085_v43 }
 0x3a8   :  { %v1021_v35 = vpop.permute.xlu0 %1020  ;;  %v2131_v55 = vpack.i.bf16 %v2085_v43, %v1012_v7 }
 0x3a9   :  { %v2739_v2 = vpop.permute.xlu1 %552 }
 0x3ac   :  { %v1032_v57 = vpop.permute.xlu0 %1031 }
 0x3ad   :  { %v979_v16 = vpop.permute.xlu1 %978 }
 0x3ae   :  { %v984_v19 = vsel %vm105_vm2, %v979_v16, %v2069_v4 }
 0x3af   :  { %v2111_v20 = vpack.i.bf16 %v984_v19, %v956_v15 }
 0x3b0   :  { %v1041_v63 = vpop.permute.xlu0 %1040 }
 0x3b1   :  { %v2078_v25 = vpop.permute.xlu1 %2077  ;;  %2112 = vrot.lane.b32.xlu1 %v2111_v20, %s2306_s20 }
 0x3b2   :  { %v2080_v30 = vunpack.i.h.bf16 %v2078_v25  ;;  %v2079_v31 = vunpack.i.l.bf16 %v2078_v25 }
 0x3b4   :  { %v1007_v40 = vsel %vm181_vm7, %v2079_v31, %v2080_v30  ;;  %v1050_v20 = vpop.permute.xlu0 %1049 }
 0x3b5   :  { %v1001_v42 = vpop.permute.xlu1 %1000  ;;  %2117 = vrot.lane.b32.xlu1 %v2116_v32, %s2306_s20  ;;  %v2121_v26 = vpack.i.bf16 %v2080_v30, %v1007_v40 }
 0x3b6   :  { %v1006_v39 = vsel %vm181_vm7, %v1001_v42, %v2079_v31  ;;  %v2769_v31 = vld [vmem:[#allocation3 + $0x20] sm:$0xff] }
 0x3b7   :  { %v2126_v53 = vpack.i.bf16 %v1006_v39, %v995_v48  ;;  %v1269_v32 = vmul.f32 %v2769_v31, %v2417_v18  ;;  %v1266_v18 = vmul.f32 %v2769_v31, %v2415_v17 }
 0x3b9   :  { %v2088_v45 = vpop.permute.xlu1 %2087  ;;  %2122 = vrot.lane.b32.xlu1 %v2121_v26, %s2306_s20 }
 0x3ba   :  { %v2089_v8 = vunpack.i.l.bf16 %v2088_v45  ;;  %v2090_v34 = vunpack.i.h.bf16 %v2088_v45 }
 0x3bc   :  { %v2141_v54 = vpack.i.bf16 %v2089_v8, %v2084_v44  ;;  %v1022_v58 = vsel %vm198_vm10, %v2089_v8, %v2090_v34  ;;  %v1023_v60 = vsel %vm198_vm10, %v2090_v34, %v1021_v35  ;;  %v2791_v44 = vld [vmem:[#allocation3 + $0x38] sm:$0xff] }
 0x3bd   :  { %v2093_v56 = vpop.permute.xlu1 %2092  ;;  %2127 = vrot.lane.b32.xlu1 %v2126_v53, %s2306_s20  ;;  %v2136_v5 = vpack.i.bf16 %v1023_v60, %v1022_v58  ;;  %v1275_v39 = vmul.f32 %v2791_v44, %v2445_v29 }
 0x3be   :  { %v2095_v62 = vunpack.i.h.bf16 %v2093_v56  ;;  %v2094_v0 = vunpack.i.l.bf16 %v2093_v56 }
 0x3c0   :  { %v1033_v6 = vsel %vm210_vm11, %v2094_v0, %v2095_v62  ;;  %v1034_v9 = vsel %vm210_vm11, %v2095_v62, %v1032_v57 }
 0x3c1   :  { %v2098_v3 = vpop.permute.xlu1 %2097  ;;  %2132 = vrot.lane.b32.xlu1 %v2131_v55, %s2306_s20  ;;  %v2146_v14 = vpack.i.bf16 %v1034_v9, %v1033_v6 }
 0x3c2   :  { %v2100_v4 = vunpack.i.h.bf16 %v2098_v3  ;;  %v2099_v11 = vunpack.i.l.bf16 %v2098_v3 }
 0x3c4   :  { %v1042_v12 = vsel %vm220_vm9, %v2099_v11, %v2100_v4  ;;  %v1043_v13 = vsel %vm220_vm9, %v2100_v4, %v1041_v63  ;;  %v2156_v16 = vpack.i.bf16 %v2099_v11, %v2094_v0 }
 0x3c5   :  { %2137 = vrot.lane.b32.xlu1 %v2136_v5, %s2306_s20  ;;  %v2151_v15 = vpack.i.bf16 %v1043_v13, %v1042_v12  ;;  %v1048_v19 = vpop.permute.xlu1 %1047 }
 0x3c6   :  { %v1053_v24 = vsel %vm232_vm12, %v1048_v19, %v1050_v20 }
 0x3c9   :  { %2147 = vrot.lane.b32.xlu1 %v2146_v14, %s2306_s20  ;;  %v1052_v25 = vpop.permute.xlu1 %1051 }
 0x3ca   :  { %v1054_v30 = vsel %vm232_vm12, %v1050_v20, %v1052_v25 }
 0x3cd   :  { %2152 = vrot.lane.b32.xlu1 %v2151_v15, %s2306_s20  ;;  %v2103_v35 = vpop.permute.xlu1 %2102 }
 0x3ce   :  { %v2105_v0 = vunpack.i.h.bf16 %v2103_v35  ;;  %v2104_v3 = vunpack.i.l.bf16 %v2103_v35 }
 0x3d1   :  { %2157 = vrot.lane.b32.xlu1 %v2156_v16, %s2306_s20 }
 0x3d5   :  { %1108 = vrot.lane.b32.xlu1 %v1053_v24, %s2306_s20 }
 0x3d9   :  { %1110 = vrot.lane.b32.xlu1 %v1054_v30, %s2306_s20  ;;  %v2808_v30 = vld [vmem:[%s2970_s6] sm:$0x3] }
 0x3dd   :  { %1106 = vrot.lane.b32.xlu1 %v1048_v19, %s2306_s20 }
 0x3e1   :  { %1285 = vrot.lane.b32.xlu1 %v2769_v31, %s2303_s18 }
 0x3e5   :  { %1307 = vrot.lane.b32.xlu1 %v1269_v32, %s2308_s22  ;;  %v1113_v32 = vsel %vm32_vm1, %v2104_v3, %v2105_v0 }
 0x410   :  { %v2108_v45 = vpop.permute.xlu1 %2107 }
 0x411   :  { %v2110_v56 = vunpack.i.h.bf16 %v2108_v45  ;;  %v2109_v57 = vunpack.i.l.bf16 %v2108_v45 }
 0x413   :  { %v1115_v9 = vsel %vm32_vm1, %v2109_v57, %v2110_v56 }
 0x423   :  { %v2113_v48 = vpop.permute.xlu1 %2112 }
 0x424   :  { %v2115_v58 = vunpack.i.h.bf16 %v2113_v48  ;;  %v2114_v60 = vunpack.i.l.bf16 %v2113_v48 }
 0x426   :  { %v1114_v4 = vsel %vm32_vm1, %v2115_v58, %v2109_v57  ;;  %v1112_v11 = vsel %vm32_vm1, %v2114_v60, %v2104_v3 }
 0x427   :  { %v2118_v7 = vpop.permute.xlu1 %2117 }
 0x428   :  { %v2120_v5 = vunpack.i.h.bf16 %v2118_v7  ;;  %v2119_v6 = vunpack.i.l.bf16 %v2118_v7 }
 0x42b   :  { %v2123_v8 = vpop.permute.xlu1 %2122 }
 0x42c   :  { %v2125_v62 = vunpack.i.h.bf16 %v2123_v8  ;;  %v2124_v29 = vunpack.i.l.bf16 %v2123_v8 }
 0x42e   :  { %v1119_v14 = vsel %vm32_vm1, %v2124_v29, %v2125_v62 }
 0x42f   :  { %v2128_v53 = vpop.permute.xlu1 %2127 }
 0x430   :  { %v2130_v63 = vunpack.i.h.bf16 %v2128_v53  ;;  %v2129_v12 = vunpack.i.l.bf16 %v2128_v53 }
 0x432   :  { %v1118_v35 = vsel %vm32_vm1, %v2130_v63, %v2124_v29 }
 0x433   :  { %v2133_v34 = vpop.permute.xlu1 %2132 }
 0x434   :  { %v2135_v15 = vunpack.i.h.bf16 %v2133_v34  ;;  %v2134_v16 = vunpack.i.l.bf16 %v2133_v34 }
 0x436   :  { %v1121_v48 = vsel %vm32_vm1, %v2134_v16, %v2135_v15 }
 0x472   :  { %v717_v36 = vpop.f32.mrb[0].mxu1 }
 0x473   :  { %v2777_v40 = vadd.f32 %v717_v36, %v2739_v2  ;;  %v719_v42 = vpop.f32.mrb[1].mxu1  ;;  %v1828_v36 = vpack.c.bf16 %v1115_v9, %v1113_v32 }
 0x474   :  { %v2780_v43 = vadd.f32 %v719_v42, %v2739_v2  ;;  %v1117_v42 = vsel %vm32_vm1, %v2119_v6, %v2120_v5 }
 0x476   :  { %v722_v26 = vadd.f32 %v2780_v43, %v2777_v40 }
 0x478   :  { %723 = vadd.xlane.f32.xlu0 %v722_v26  ;;  %v1830_v26 = vpack.c.bf16 %v1114_v4, %v1112_v11 }
 0x48e   :  { %2142 = vrot.lane.b32.xlu0 %v2141_v54, %s2306_s20  ;;  %v2138_v54 = vpop.permute.xlu1 %2137 }
 0x48f   :  { %v2140_v19 = vunpack.i.h.bf16 %v2138_v54  ;;  %v2139_v20 = vunpack.i.l.bf16 %v2138_v54 }
 0x491   :  { %v1123_v7 = vsel %vm32_vm1, %v2139_v20, %v2140_v19 }
 0x492   :  { %1296 = vrot.lane.b32.xlu0 %v1266_v18, %s2309_s23  ;;  %v2797_v55 = vpop.permute.xlu1 %2147  ;;  %v1116_v18 = vsel %vm32_vm1, %v2129_v12, %v2119_v6  ;;  %v1836_v62 = vpack.c.bf16 %v1123_v7, %v1121_v48 }
 0x493   :  { %v1834_v57 = vpack.c.bf16 %v1118_v35, %v1116_v18  ;;  %v2150_v58 = vunpack.i.h.bf16 %v2797_v55  ;;  %v2149_v60 = vunpack.i.l.bf16 %v2797_v55 }
 0x495   :  { %v1125_v9 = vsel %vm32_vm1, %v2149_v60, %v2150_v58 }
 0x496   :  { %1327 = vrot.lane.b32.xlu0 %v1275_v39, %s2311_s25  ;;  %v2799_v17 = vpop.permute.xlu1 %2152  ;;  %v1832_v39 = vpack.c.bf16 %v1119_v14, %v1117_v42 }
 0x497   :  { %v2155_v8 = vunpack.i.h.bf16 %v2799_v17  ;;  %v2154_v53 = vunpack.i.l.bf16 %v2799_v17 }
 0x499   :  { %v1127_v17 = vsel %vm32_vm1, %v2154_v53, %v2155_v8 }
 0x49a   :  { %v2158_v13 = vpop.permute.xlu1 %2157  ;;  %v1840_v55 = vpack.c.bf16 %v1127_v17, %v1125_v9 }
 0x49b   :  { %v2160_v29 = vunpack.i.h.bf16 %v2158_v13  ;;  %v2159_v0 = vunpack.i.l.bf16 %v2158_v13 }
 0x49d   :  { %v1124_v11 = vsel %vm32_vm1, %v2159_v0, %v2149_v60  ;;  %v1126_v63 = vsel %vm32_vm1, %v2160_v29, %v2154_v53 }
 0x49e   :  { %v1109_v34 = vpop.permute.xlu1 %1108  ;;  %v1842_v12 = vpack.c.bf16 %v1126_v63, %v1124_v11 }
 0x4a2   :  { %v1111_v5 = vpop.permute.xlu1 %1110 }
 0x4a3   :  { %v1129_v14 = vsel %vm32_vm1, %v1109_v34, %v1111_v5 }
 0x4a6   :  { %v1107_v13 = vpop.permute.xlu1 %1106 }
 0x4a7   :  { %v1128_v15 = vsel %vm32_vm1, %v1107_v13, %v1109_v34 }
 0x505   :  { %v724_v24 = vpop.xlane.xlu0 %723 }
 0x506   :  { %v725_v25 = vmul.f32 0.00390625, %v724_v24 }
 0x508   :  { %1777 = vmatpush3.msra.mxu0 %v725_v25 }
 0x509   :  { %1779 = vmatmul.mubr.msk.f32.vlgmr.msra.gmra.mrb[2].mxu0 %vm726_vm3, %v2808_v30  ;;  %1829 = vmatprep.subr.bf16.mxu0 %v1828_v36  ;;  %v2143_v45 = vpop.permute.xlu0 %2142 }
 0x50a   :  { %v2145_v54 = vunpack.i.h.bf16 %v2143_v45  ;;  %v2144_v56 = vunpack.i.l.bf16 %v2143_v45  ;;  %1831 = vmatpush1.bf16.msra.mxu0 %v1830_v26  ;;  %1212 = vmatprep.mubr.f32.mxu0 %v2301_v1 }
 0x50b   :  { %1833 = vmatprep.subr.bf16.mxu0 %v1832_v39 }
 0x50c   :  { %v1122_v3 = vsel %vm32_vm1, %v2145_v54, %v2139_v20  ;;  %v1120_v4 = vsel %vm32_vm1, %v2144_v56, %v2134_v16 }
 0x50d   :  { %v1838_v6 = vpack.c.bf16 %v1122_v3, %v1120_v4 }
 0x50e   :  { %1835 = vmatpush1.bf16.msra.mxu0 %v1834_v57 }
 0x50f   :  { %1837 = vmatprep.subr.bf16.mxu0 %v1836_v62 }
 0x512   :  { %1839 = vmatpush1.bf16.msra.mxu0 %v1838_v6 }
 0x513   :  { %1841 = vmatprep.subr.bf16.mxu0 %v1840_v55 }
 0x516   :  { %1843 = vmatpush1.bf16.msra.mxu0 %v1842_v12 }
 0x517   :  { %1164 = vmatprep.subr.mxu0 %v1129_v14 }
 0x51a   :  { %1165 = vmatpush1.msra.mxu0 %v1128_v15 }
 0x51b   :  { %1759 = vmatmul.mubr.msk.f32.vlgmr.msra.gmra.mrb[4].mxu0 %vm333_vm13, %v2584_v59  ;;  %1786 = vmatprep.subr.mxu0 %v2301_v1 }
 0x51c   :  { %1788 = vmatprep.mubr.msk.f32.mxu0 %vm2315_vm0, %v2301_v1 }
 0x5dc   :  { %v796_v16 = vpop.f32.mrb[2].mxu0 }
 0x5dd   :  { %v800_v19 = vand.u32 2147483647, %v796_v16  ;;  %v1780_v20 = vpop.f32.mrb[3].mxu0  ;;  %vm805_vm4 = vcmp.ge.f32.partialorder %v796_v16, 0.0 }
 0x5df   :  { %v801_v24 = vsub.f32 0.0, %v800_v19 }
 0x5e1   :  { %v802_v25 = vmul.f32 1.442695, %v801_v24 }
 0x5e3   :  { %2265 = vpow2.f32 %v802_v25  ;;  %v2841_v25 = vld [vmem:[%s2971_s7] sm:$0xff] }
 0x5ed   :  { %v2266_v32 = vpop.eup %2265 }
 0x5ee   :  { %v804_v36 = vmul.f32 %v2266_v32, %v2266_v32  ;;  %v806_v42 = vmul.f32 2.0, %v2266_v32  ;;  %v1214_v26 = vpop.f32.mrb[4].mxu0 }
 0x5ef   :  { %v1215_v18 = vadd.f32 %v1214_v26, %v2590_v61  ;;  %v1216_v39 = vpop.f32.mrb[5].mxu0 }
 0x5f0   :  { %v807_v35 = vadd.f32 1.0, %v806_v42  ;;  %v808_v59 = vadd.f32 %v806_v42, %v804_v36  ;;  %v810_v45 = vmul.f32 2.0, %v804_v36  ;;  %v1217_v48 = vadd.f32 %v1216_v39, %v2590_v61 }
 0x5f1   :  { %v1219_v7 = vand.u32 2147483647, %v1215_v18  ;;  %vm1229_vm15 = vcmp.ge.f32.partialorder %v1215_v18, 0.0 }
 0x5f2   :  { %v809_v8 = vsel %vm805_vm4, %v807_v35, %v808_v59  ;;  %v811_v53 = vsel %vm805_vm4, %v810_v45, 2.0  ;;  %v1220_v34 = vand.u32 2147483647, %v1217_v48  ;;  %vm1230_vm4 = vcmp.ge.f32.partialorder %v1217_v48, 0.0 }
 0x5f3   :  { %v812_v54 = vadd.f32 %v811_v53, %v809_v8  ;;  %v1221_v56 = vsub.f32 0.0, %v1219_v7  ;;  %v817_v5 = vmul.f32 %v809_v8, %v796_v16 }
 0x5f4   :  { %v1222_v57 = vsub.f32 0.0, %v1220_v34 }
 0x5f5   :  { %2267 = vrcp.f32 %v812_v54  ;;  %v1223_v58 = vmul.f32 1.442695, %v1221_v56 }
 0x5f6   :  { %v1225_v60 = vmul.f32 1.442695, %v1222_v57 }
 0x5f7   :  { %2269 = vpow2.f32 %v1223_v58 }
 0x5f8   :  { %2271 = vpow2.f32 %v1225_v60 }
 0x5ff   :  { %v2268_v62 = vpop.eup %2267 }
 0x600   :  { %v814_v29 = vmul.f32 %v2268_v62, %v812_v54 }
 0x601   :  { %v2270_v0 = vpop.eup %2269 }
 0x602   :  { %v2272_v3 = vpop.eup %2271  ;;  %v815_v4 = vsub.f32 2.0, %v814_v29  ;;  %v1227_v17 = vmul.f32 %v2270_v0, %v2270_v0  ;;  %v1231_v61 = vmul.f32 2.0, %v2270_v0 }
 0x603   :  { %v1228_v6 = vmul.f32 %v2272_v3, %v2272_v3  ;;  %v1232_v9 = vmul.f32 2.0, %v2272_v3 }
 0x604   :  { %v816_v11 = vmul.f32 %v2268_v62, %v815_v4  ;;  %v1233_v63 = vadd.f32 1.0, %v1231_v61  ;;  %v1235_v55 = vadd.f32 %v1231_v61, %v1227_v17  ;;  %v1239_v12 = vmul.f32 2.0, %v1227_v17 }
 0x605   :  { %v1234_v13 = vadd.f32 1.0, %v1232_v9  ;;  %v1236_v14 = vadd.f32 %v1232_v9, %v1228_v6  ;;  %v1240_v15 = vmul.f32 2.0, %v1228_v6 }
 0x606   :  { %v818_v19 = vmul.f32 %v817_v5, %v816_v11  ;;  %v1237_v20 = vsel %vm1229_vm15, %v1233_v63, %v1235_v55  ;;  %v1241_v24 = vsel %vm1229_vm15, %v1239_v12, 2.0  ;;  %v1263_v55 = vmul.f32 %v2769_v31, %v2490_v50 }
 0x607   :  { %v1243_v16 = vadd.f32 %v1241_v24, %v1237_v20  ;;  %v1238_v32 = vsel %vm1230_vm4, %v1234_v13, %v1236_v14  ;;  %v1242_v36 = vsel %vm1230_vm4, %v1240_v15, 2.0  ;;  %v1253_v53 = vmul.f32 %v1237_v20, %v1215_v18 }
 0x608   :  { %v1244_v42 = vadd.f32 %v1242_v36, %v1238_v32  ;;  %1782 = vmatpush3.msk.msra.mxu1 %vm823_vm5, %v818_v19  ;;  %v1254_v54 = vmul.f32 %v1238_v32, %v1217_v48 }
 0x609   :  { %2273 = vrcp.f32 %v1243_v16  ;;  %1784 = vmatmul.mubr.msk.f32.vlgmr.msra.gmra.mrb[2].mxu1 %vm819_vm14, %v2841_v25 }
 0x60a   :  { %2275 = vrcp.f32 %v1244_v42  ;;  %1519 = vmatprep.mubr.f32.mxu1 %v2301_v1 }
 0x613   :  { %v2274_v26 = vpop.eup %2273 }
 0x614   :  { %v2276_v39 = vpop.eup %2275  ;;  %v1247_v35 = vmul.f32 %v2274_v26, %v1243_v16 }
 0x615   :  { %v1248_v59 = vmul.f32 %v2276_v39, %v1244_v42 }
 0x616   :  { %v1249_v45 = vsub.f32 2.0, %v1247_v35 }
 0x617   :  { %v1250_v7 = vsub.f32 2.0, %v1248_v59 }
 0x618   :  { %v1251_v8 = vmul.f32 %v2274_v26, %v1249_v45 }
 0x619   :  { %v1252_v34 = vmul.f32 %v2276_v39, %v1250_v7 }
 0x61a   :  { %v1255_v56 = vmul.f32 %v1253_v53, %v1251_v8 }
 0x61b   :  { %v1256_v57 = vmul.f32 %v1254_v54, %v1252_v34 }
 0x61c   :  { %v1270_v58 = vmul.f32 %v1255_v56, %v2432_v23  ;;  %v1273_v60 = vmul.f32 %v1255_v56, %v2443_v28  ;;  %v1267_v62 = vmul.f32 %v1255_v56, %v2440_v27  ;;  %v1276_v29 = vmul.f32 %v1255_v56, %v2462_v37 }
 0x61d   :  { %v2176_v0 = vpack.i.bf16 %v1256_v57, %v1255_v56  ;;  %v1271_v3 = vmul.f32 %v1256_v57, %v2427_v22  ;;  %v1274_v4 = vmul.f32 %v1256_v57, %v2452_v33  ;;  %v1268_v17 = vmul.f32 %v1256_v57, %v2425_v21 }
 0x61e   :  { %v1277_v18 = vmul.f32 %v1256_v57, %v2468_v41  ;;  %v1264_v48 = vmul.f32 %v1255_v56, %v2497_v52  ;;  %v1265_v37 = vmul.f32 %v1256_v57, %v2492_v51  ;;  %v1278_v21 = vmul.f32 %v2791_v44, %v2464_v38  ;;  %v1286_v38 = vpop.permute.xlu1 %1285  ;;  %v1297_v51 = vpop.permute.xlu0 %1296 }
 0x61f   :  { %2177 = vrot.lane.b32.xlu1 %v2176_v0, %s2310_s24  ;;  %2162 = vrot.lane.b32.xlu0 %v2176_v0, %s2303_s18  ;;  %v2181_v23 = vpack.i.bf16 %v1271_v3, %v1270_v58  ;;  %v2186_v28 = vpack.i.bf16 %v1274_v4, %v1273_v60  ;;  %v2171_v27 = vpack.i.bf16 %v1268_v17, %v1267_v62 }
 0x620   :  { %v2191_v61 = vpack.i.bf16 %v1277_v18, %v1276_v29  ;;  %v2196_v5 = vpack.i.bf16 %v1265_v37, %v1264_v48  ;;  %v1279_v22 = vmul.f32 %v1255_v56, %v2477_v46  ;;  %v1281_v33 = vmul.f32 %v2791_v44, %v2479_v47 }
 0x621   :  { %v1280_v41 = vmul.f32 %v1256_v57, %v2488_v49 }
 0x622   :  { %v1308_v52 = vpop.permute.xlu1 %1307  ;;  %v1328_v46 = vpop.permute.xlu0 %1327 }
 0x623   :  { %2167 = vrot.lane.b32.xlu0 %v2176_v0, %s2307_s21  ;;  %2182 = vrot.lane.b32.xlu1 %v2181_v23, %s2308_s22 }
 0x627   :  { %2187 = vrot.lane.b32.xlu1 %v2186_v28, %s2311_s25  ;;  %2172 = vrot.lane.b32.xlu0 %v2171_v27, %s2309_s23 }
 0x62b   :  { %2192 = vrot.lane.b32.xlu1 %v2191_v61, %s2312_s26  ;;  %1338 = vrot.lane.b32.xlu0 %v1278_v21, %s2312_s26 }
 0x62f   :  { %1354 = vrot.lane.b32.xlu1 %v1279_v22, %s2313_s27  ;;  %1347 = vrot.lane.b32.xlu0 %v2791_v44, %s2310_s24 }
 0x633   :  { %1358 = vrot.lane.b32.xlu1 %v1281_v33, %s2313_s27  ;;  %1356 = vrot.lane.b32.xlu0 %v1280_v41, %s2313_s27 }
 0x637   :  { %2197 = vrot.lane.b32.xlu0 %v2196_v5, %s2306_s20 }
 0x691   :  { %v2178_v6 = vpop.permute.xlu1 %2177  ;;  %v2163_v9 = vpop.permute.xlu0 %2162 }
 0x692   :  { %v2165_v11 = vunpack.i.h.bf16 %v2163_v9  ;;  %v2164_v63 = vunpack.i.l.bf16 %v2163_v9  ;;  %v2180_v54 = vunpack.i.h.bf16 %v2178_v6  ;;  %v2179_v56 = vunpack.i.l.bf16 %v2178_v6 }
 0x694   :  { %v1292_v47 = vsel %vm105_vm2, %v2164_v63, %v2165_v11  ;;  %v1291_v49 = vsel %vm105_vm2, %v1286_v38, %v2164_v63  ;;  %v1349_v18 = vsel %vm220_vm9, %v2179_v56, %v2180_v54 }
 0x695   :  { %v2206_v44 = vpack.i.bf16 %v2165_v11, %v1292_v47  ;;  %v2201_v12 = vpack.i.bf16 %v1291_v49, %v1263_v55  ;;  %v2168_v13 = vpop.permute.xlu0 %2167  ;;  %v2183_v14 = vpop.permute.xlu1 %2182 }
 0x696   :  { %v2170_v15 = vunpack.i.h.bf16 %v2168_v13  ;;  %v2169_v19 = vunpack.i.l.bf16 %v2168_v13  ;;  %v2185_v20 = vunpack.i.h.bf16 %v2183_v14  ;;  %v2184_v24 = vunpack.i.l.bf16 %v2183_v14 }
 0x697   :  { %2207 = vrot.lane.b32.xlu1 %v2206_v44, %s2306_s20  ;;  %2202 = vrot.lane.b32.xlu0 %v2201_v12, %s2306_s20 }
 0x698   :  { %v1319_v16 = vsel %vm81_vm6, %v2169_v19, %v2170_v15  ;;  %v1314_v31 = vsel %vm181_vm7, %v2184_v24, %v2185_v20  ;;  %v1313_v35 = vsel %vm181_vm7, %v1308_v52, %v2184_v24 }
 0x699   :  { %v2211_v32 = vpack.i.bf16 %v2170_v15, %v1319_v16  ;;  %v2173_v50 = vpop.permute.xlu0 %2172  ;;  %v2188_v36 = vpop.permute.xlu1 %2187  ;;  %v2226_v39 = vpack.i.bf16 %v2185_v20, %v1314_v31 }
 0x69a   :  { %v2174_v42 = vunpack.i.l.bf16 %v2173_v50  ;;  %v2175_v26 = vunpack.i.h.bf16 %v2173_v50  ;;  %v2189_v59 = vunpack.i.l.bf16 %v2188_v36  ;;  %v2190_v53 = vunpack.i.h.bf16 %v2188_v36 }
 0x69b   :  { %2212 = vrot.lane.b32.xlu0 %v2211_v32, %s2306_s20 }
 0x69c   :  { %v1302_v45 = vsel %vm169_vm8, %v1297_v51, %v2174_v42  ;;  %v1303_v34 = vsel %vm169_vm8, %v2174_v42, %v2175_v26  ;;  %v2231_v58 = vpack.i.bf16 %v2189_v59, %v2169_v19  ;;  %v1330_v0 = vsel %vm198_vm10, %v2190_v53, %v1328_v46 }
 0x69d   :  { %v1339_v7 = vpop.permute.xlu0 %1338  ;;  %v2216_v8 = vpack.i.bf16 %v1313_v35, %v1302_v45  ;;  %v2193_v57 = vpop.permute.xlu1 %2192  ;;  %v2221_v62 = vpack.i.bf16 %v2175_v26, %v1303_v34  ;;  %v1329_v3 = vsel %vm198_vm10, %v2189_v59, %v2190_v53 }
 0x69e   :  { %v2195_v4 = vunpack.i.h.bf16 %v2193_v57  ;;  %v2194_v17 = vunpack.i.l.bf16 %v2193_v57  ;;  %v2241_v23 = vpack.i.bf16 %v1330_v0, %v1329_v3 }
 0x69f   :  { %2227 = vrot.lane.b32.xlu0 %v2226_v39, %s2306_s20  ;;  %2217 = vrot.lane.b32.xlu1 %v2216_v8, %s2306_s20 }
 0x6a0   :  { %v1340_v28 = vsel %vm210_vm11, %v2194_v17, %v2195_v4  ;;  %v1341_v27 = vsel %vm210_vm11, %v2195_v4, %v1339_v7  ;;  %v2251_v22 = vpack.i.bf16 %v2179_v56, %v2194_v17 }
 0x6a1   :  { %v1348_v60 = vpop.permute.xlu0 %1347  ;;  %v1355_v37 = vpop.permute.xlu1 %1354  ;;  %v2246_v5 = vpack.i.bf16 %v1341_v27, %v1340_v28 }
 0x6a2   :  { %v1350_v29 = vsel %vm220_vm9, %v2180_v54, %v1348_v60 }
 0x6a3   :  { %2232 = vrot.lane.b32.xlu0 %v2231_v58, %s2306_s20  ;;  %2222 = vrot.lane.b32.xlu1 %v2221_v62, %s2306_s20  ;;  %v2236_v48 = vpack.i.bf16 %v1350_v29, %v1349_v18 }
 0x6a5   :  { %v1357_v61 = vpop.permute.xlu0 %1356  ;;  %v1359_v33 = vpop.permute.xlu1 %1358 }
 0x6a6   :  { %v1360_v21 = vsel %vm232_vm12, %v1355_v37, %v1357_v61  ;;  %v1361_v41 = vsel %vm232_vm12, %v1357_v61, %v1359_v33 }
 0x6a7   :  { %2237 = vrot.lane.b32.xlu0 %v2236_v48, %s2306_s20  ;;  %2242 = vrot.lane.b32.xlu1 %v2241_v23, %s2306_s20 }
 0x6a9   :  { %v2198_v11 = vpop.permute.xlu0 %2197 }
 0x6aa   :  { %v2200_v63 = vunpack.i.h.bf16 %v2198_v11  ;;  %v2199_v55 = vunpack.i.l.bf16 %v2198_v11 }
 0x6ab   :  { %1415 = vrot.lane.b32.xlu0 %v1360_v21, %s2306_s20  ;;  %2247 = vrot.lane.b32.xlu1 %v2246_v5, %s2306_s20 }
 0x6ac   :  { %v1420_v20 = vsel %vm32_vm1, %v2199_v55, %v2200_v63 }
 0x6af   :  { %1413 = vrot.lane.b32.xlu0 %v1355_v37, %s2306_s20  ;;  %2252 = vrot.lane.b32.xlu1 %v2251_v22, %s2306_s20 }
 0x6b3   :  { %1417 = vrot.lane.b32.xlu1 %v1361_v41, %s2306_s20 }
 0x6dc   :  { %v893_v38 = vpop.f32.mrb[2].mxu1 }
 0x6dd   :  { %v897_v51 = vmul.f32 0.5, %v893_v38  ;;  %v1785_v52 = vpop.f32.mrb[3].mxu1 }
 0x6df   :  { %2277 = vtanh.f32 %v897_v51 }
 0x6e9   :  { %v2278_v46 = vpop.eup %2277 }
 0x6ea   :  { %v899_v6 = vadd.f32 1.0, %v2278_v46 }
 0x6ec   :  { %v900_v9 = vmul.f32 0.5, %v899_v6 }
 0x6ee   :  { %903 = vperm.xlu0 %2256, %v900_v9  }
 0x709   :  { %v2208_v47 = vpop.permute.xlu1 %2207  ;;  %v2203_v49 = vpop.permute.xlu0 %2202 }
 0x70a   :  { %v2210_v44 = vunpack.i.h.bf16 %v2208_v47  ;;  %v2209_v12 = vunpack.i.l.bf16 %v2208_v47  ;;  %v2205_v13 = vunpack.i.h.bf16 %v2203_v49  ;;  %v2204_v14 = vunpack.i.l.bf16 %v2203_v49 }
 0x70c   :  { %v1421_v15 = vsel %vm32_vm1, %v2205_v13, %v2209_v12  ;;  %v1419_v19 = vsel %vm32_vm1, %v2204_v14, %v2199_v55  ;;  %v1422_v24 = vsel %vm32_vm1, %v2209_v12, %v2210_v44  ;;  %v908_v14 = vld [vmem:[%s2965_s0] sm:$0xff] }
 0x70d   :  { %v1846_v16 = vpack.c.bf16 %v1421_v15, %v1419_v19  ;;  %v2213_v32 = vpop.permute.xlu0 %2212  ;;  %v1844_v50 = vpack.c.bf16 %v1422_v24, %v1420_v20  ;;  %v909_v15 = vld [vmem:[%s2965_s0 + $0x8] sm:$0xff] }
 0x70e   :  { %v2215_v53 = vunpack.i.h.bf16 %v2213_v32  ;;  %v2214_v34 = vunpack.i.l.bf16 %v2213_v32 }
 0x70f   :  { %1845 = vmatprep.subr.bf16.mxu1 %v1844_v50 }
 0x710   :  { %1847 = vmatpush1.bf16.msra.mxu1 %v1846_v16  ;;  %v1428_v23 = vsel %vm32_vm1, %v2214_v34, %v2215_v53 }
 0x711   :  { %v2228_v31 = vpop.permute.xlu0 %2227  ;;  %v2218_v36 = vpop.permute.xlu1 %2217 }
 0x712   :  { %v2220_v42 = vunpack.i.h.bf16 %v2218_v36  ;;  %v2230_v26 = vunpack.i.h.bf16 %v2228_v31  ;;  %v2229_v39 = vunpack.i.l.bf16 %v2228_v31  ;;  %v2219_v45 = vunpack.i.l.bf16 %v2218_v36 }
 0x714   :  { %v1425_v56 = vsel %vm32_vm1, %v2220_v42, %v2229_v39  ;;  %v1426_v60 = vsel %vm32_vm1, %v2229_v39, %v2230_v26 }
 0x715   :  { %v2233_v35 = vpop.permute.xlu0 %2232  ;;  %v2223_v59 = vpop.permute.xlu1 %2222 }
 0x716   :  { %v2225_v7 = vunpack.i.h.bf16 %v2223_v59  ;;  %v2224_v8 = vunpack.i.l.bf16 %v2223_v59  ;;  %v2234_v54 = vunpack.i.l.bf16 %v2233_v35  ;;  %v2235_v4 = vunpack.i.h.bf16 %v2233_v35 }
 0x718   :  { %v1423_v57 = vsel %vm32_vm1, %v2219_v45, %v2224_v8  ;;  %v1424_v58 = vsel %vm32_vm1, %v2224_v8, %v2225_v7  ;;  %v1427_v48 = vsel %vm32_vm1, %v2234_v54, %v2214_v34 }
 0x719   :  { %v1850_v62 = vpack.c.bf16 %v1425_v56, %v1423_v57  ;;  %v2243_v29 = vpop.permute.xlu1 %2242  ;;  %v2238_v0 = vpop.permute.xlu0 %2237  ;;  %v1848_v3 = vpack.c.bf16 %v1426_v60, %v1424_v58 }
 0x71a   :  { %v2245_v17 = vunpack.i.h.bf16 %v2243_v29  ;;  %v2244_v18 = vunpack.i.l.bf16 %v2243_v29  ;;  %v2240_v27 = vunpack.i.h.bf16 %v2238_v0  ;;  %v2239_v61 = vunpack.i.l.bf16 %v2238_v0 }
 0x71b   :  { %1849 = vmatprep.subr.bf16.mxu1 %v1848_v3 }
 0x71c   :  { %v1429_v28 = vsel %vm32_vm1, %v2235_v4, %v2244_v18  ;;  %1851 = vmatpush1.bf16.msra.mxu1 %v1850_v62  ;;  %v1430_v37 = vsel %vm32_vm1, %v2244_v18, %v2245_v17  ;;  %v1434_v51 = vsel %vm32_vm1, %v2239_v61, %v2240_v27 }
 0x71d   :  { %v1854_v5 = vpack.c.bf16 %v1429_v28, %v1427_v48  ;;  %v2248_v21 = vpop.permute.xlu1 %2247  ;;  %v1852_v22 = vpack.c.bf16 %v1430_v37, %v1428_v23  ;;  %v1416_v52 = vpop.permute.xlu0 %1415 }
 0x71e   :  { %v2250_v33 = vunpack.i.h.bf16 %v2248_v21  ;;  %v2249_v41 = vunpack.i.l.bf16 %v2248_v21 }
 0x71f   :  { %1853 = vmatprep.subr.bf16.mxu1 %v1852_v22 }
 0x720   :  { %1855 = vmatpush1.bf16.msra.mxu1 %v1854_v5  ;;  %v1432_v38 = vsel %vm32_vm1, %v2249_v41, %v2250_v33 }
 0x721   :  { %v2253_v46 = vpop.permute.xlu1 %2252  ;;  %v1856_v6 = vpack.c.bf16 %v1434_v51, %v1432_v38  ;;  %v1414_v12 = vpop.permute.xlu0 %1413 }
 0x722   :  { %v2255_v9 = vunpack.i.h.bf16 %v2253_v46  ;;  %v2254_v11 = vunpack.i.l.bf16 %v2253_v46  ;;  %v1435_v13 = vsel %vm32_vm1, %v1414_v12, %v1416_v52 }
 0x723   :  { %1857 = vmatprep.subr.bf16.mxu1 %v1856_v6 }
 0x724   :  { %v1431_v63 = vsel %vm32_vm1, %v2254_v11, %v2249_v41  ;;  %v1433_v55 = vsel %vm32_vm1, %v2255_v9, %v2239_v61 }
 0x725   :  { %v1858_v47 = vpack.c.bf16 %v1433_v55, %v1431_v63  ;;  %v1418_v49 = vpop.permute.xlu1 %1417 }
 0x726   :  { %v1436_v44 = vsel %vm32_vm1, %v1416_v52, %v1418_v49 }
 0x727   :  { %1859 = vmatpush1.bf16.msra.mxu1 %v1858_v47 }
 0x728   :  { %1471 = vmatprep.subr.mxu1 %v1436_v44 }
 0x72b   :  { %1472 = vmatpush1.msra.mxu1 %v1435_v13 }
 0x72c   :  { %1760 = vmatmul.mubr.msk.f32.vlgmr.msra.gmra.mrb[4].mxu1 %vm333_vm13, %v2732_v10  ;;  %1791 = vmatprep.subr.mxu1 %v2301_v1 }
 0x72d   :  { %1793 = vmatprep.mubr.msk.f32.mxu1 %vm2315_vm0, %v2301_v1 }
 0x76d   :  { %v904_v19 = vpop.permute.xlu0 %903 }
 0x76e   :  { %v906_v20 = vmul.f32 %v904_v19, %v2777_v40  ;;  %v907_v24 = vmul.f32 %v904_v19, %v2780_v43 }
 0x770   :  { %v910_v16 = vadd.f32 %v908_v14, %v906_v20  ;;  %v911_v10 = vadd.f32 %v909_v15, %v907_v24 }
 0x772   :  { %v912_v32 = vand.u32 2147483647, %v910_v16  ;;  %v913_v50 = vand.u32 2147483647, %v911_v10  ;;  %vm922_vm1 = vcmp.ge.f32.partialorder %v910_v16, 0.0  ;;  %vm923_vm2 = vcmp.ge.f32.partialorder %v911_v10, 0.0 }
 0x774   :  { %v914_v31 = vsub.f32 0.0, %v912_v32  ;;  %v915_v36 = vsub.f32 0.0, %v913_v50 }
 0x776   :  { %v916_v1 = vmul.f32 1.442695, %v914_v31  ;;  %v918_v42 = vmul.f32 1.442695, %v915_v36 }
 0x778   :  { %2279 = vpow2.f32 %v916_v1 }
 0x779   :  { %2281 = vpow2.f32 %v918_v42 }
 0x782   :  { %v2280_v26 = vpop.eup %2279 }
 0x783   :  { %v2282_v39 = vpop.eup %2281  ;;  %v920_v35 = vmul.f32 %v2280_v26, %v2280_v26  ;;  %v924_v59 = vmul.f32 2.0, %v2280_v26  ;;  %v1764_v26 = vld [vmem:[%s2965_s0 + $0x10] sm:$0xff] }
 0x784   :  { %v921_v45 = vmul.f32 %v2282_v39, %v2282_v39  ;;  %v925_v7 = vmul.f32 2.0, %v2282_v39  ;;  %v1765_v39 = vld [vmem:[%s2965_s0 + $0x18] sm:$0xff] }
 0x785   :  { %v926_v8 = vadd.f32 1.0, %v924_v59  ;;  %v928_v40 = vadd.f32 %v924_v59, %v920_v35  ;;  %v932_v53 = vmul.f32 2.0, %v920_v35 }
 0x786   :  { %v927_v43 = vadd.f32 1.0, %v925_v7  ;;  %v929_v34 = vadd.f32 %v925_v7, %v921_v45  ;;  %v933_v54 = vmul.f32 2.0, %v921_v45 }
 0x787   :  { %v930_v56 = vsel %vm922_vm1, %v926_v8, %v928_v40  ;;  %v934_v57 = vsel %vm922_vm1, %v932_v53, 2.0 }
 0x788   :  { %v931_v58 = vsel %vm923_vm2, %v927_v43, %v929_v34  ;;  %v935_v60 = vsel %vm923_vm2, %v933_v54, 2.0  ;;  %v936_v62 = vadd.f32 %v934_v57, %v930_v56  ;;  %v946_v28 = vmul.f32 %v930_v56, %v910_v16 }
 0x789   :  { %v937_v29 = vadd.f32 %v935_v60, %v931_v58  ;;  %v947_v61 = vmul.f32 %v931_v58, %v911_v10 }
 0x78a   :  { %2283 = vrcp.f32 %v936_v62 }
 0x78b   :  { %2285 = vrcp.f32 %v937_v29 }
 0x794   :  { %v2284_v0 = vpop.eup %2283 }
 0x795   :  { %v2286_v3 = vpop.eup %2285  ;;  %v940_v4 = vmul.f32 %v2284_v0, %v936_v62 }
 0x796   :  { %v941_v17 = vmul.f32 %v2286_v3, %v937_v29 }
 0x797   :  { %v942_v18 = vsub.f32 2.0, %v940_v4 }
 0x798   :  { %v943_v48 = vsub.f32 2.0, %v941_v17 }
 0x799   :  { %v944_v23 = vmul.f32 %v2284_v0, %v942_v18 }
 0x79a   :  { %v945_v27 = vmul.f32 %v2286_v3, %v943_v48 }
 0x79b   :  { %v948_v37 = vmul.f32 %v946_v28, %v944_v23 }
 0x79c   :  { %v949_v5 = vmul.f32 %v947_v61, %v945_v27 }
 0x79d   :  { %950 = vst [vmem:[%s2972_s8] sm:$0xff] %v948_v37 }
 0x79e   :  { %951 = vst [vmem:[%s2972_s8 + $0x8] sm:$0xff] %v949_v5 }
 0x7ff   :  { %v1521_v21 = vpop.f32.mrb[4].mxu1 }
 0x800   :  { %v1522_v22 = vadd.f32 %v1521_v21, %v2739_v2  ;;  %v1523_v33 = vpop.f32.mrb[5].mxu1 }
 0x801   :  { %v1524_v41 = vadd.f32 %v1523_v33, %v2739_v2 }
 0x803   :  { %v1526_v38 = vadd.f32 %v1524_v41, %v1522_v22 }
 0x805   :  { %1527 = vadd.xlane.f32.xlu1 %v1526_v38 }
 0x892   :  { %v1528_v51 = vpop.xlane.xlu1 %1527 }
 0x893   :  { %v1529_v52 = vmul.f32 0.00390625, %v1528_v51 }
 0x895   :  { %1787 = vmatpush3.msra.mxu0 %v1529_v52 }
 0x896   :  { %1789 = vmatmul.mubr.msk.f32.vlgmr.msra.gmra.mrb[6].mxu0 %vm726_vm3, %v2808_v30 }
 0x969   :  { %v1596_v46 = vpop.f32.mrb[6].mxu0 }
 0x96a   :  { %v1600_v6 = vand.u32 2147483647, %v1596_v46  ;;  %v1790_v9 = vpop.f32.mrb[7].mxu0  ;;  %vm1605_vm6 = vcmp.ge.f32.partialorder %v1596_v46, 0.0 }
 0x96c   :  { %v1601_v11 = vsub.f32 0.0, %v1600_v6 }
 0x96e   :  { %v1602_v63 = vmul.f32 1.442695, %v1601_v11 }
 0x970   :  { %2287 = vpow2.f32 %v1602_v63 }
 0x97a   :  { %v2288_v55 = vpop.eup %2287 }
 0x97b   :  { %v1604_v47 = vmul.f32 %v2288_v55, %v2288_v55  ;;  %v1606_v49 = vmul.f32 2.0, %v2288_v55 }
 0x97d   :  { %v1607_v44 = vadd.f32 1.0, %v1606_v49  ;;  %v1608_v12 = vadd.f32 %v1606_v49, %v1604_v47  ;;  %v1610_v2 = vmul.f32 2.0, %v1604_v47 }
 0x97f   :  { %v1609_v13 = vsel %vm1605_vm6, %v1607_v44, %v1608_v12  ;;  %v1611_v14 = vsel %vm1605_vm6, %v1610_v2, 2.0 }
 0x980   :  { %v1612_v15 = vadd.f32 %v1611_v14, %v1609_v13  ;;  %v1617_v16 = vmul.f32 %v1609_v13, %v1596_v46 }
 0x982   :  { %2289 = vrcp.f32 %v1612_v15 }
 0x98c   :  { %v2290_v19 = vpop.eup %2289 }
 0x98d   :  { %v1614_v20 = vmul.f32 %v2290_v19, %v1612_v15 }
 0x98f   :  { %v1615_v30 = vsub.f32 2.0, %v1614_v20 }
 0x991   :  { %v1616_v24 = vmul.f32 %v2290_v19, %v1615_v30 }
 0x993   :  { %v1618_v10 = vmul.f32 %v1617_v16, %v1616_v24 }
 0x995   :  { %1792 = vmatpush3.msk.msra.mxu1 %vm823_vm5, %v1618_v10 }
 0x996   :  { %1794 = vmatmul.mubr.msk.f32.vlgmr.msra.gmra.mrb[6].mxu1 %vm819_vm14, %v2841_v25 }
 0xa69   :  { %v1688_v32 = vpop.f32.mrb[6].mxu1 }
 0xa6a   :  { %v1692_v50 = vmul.f32 0.5, %v1688_v32  ;;  %v1795_v31 = vpop.f32.mrb[7].mxu1 }
 0xa6c   :  { %2291 = vtanh.f32 %v1692_v50 }
 0xa76   :  { %v2292_v36 = vpop.eup %2291 }
 0xa77   :  { %v1694_v1 = vadd.f32 1.0, %v2292_v36 }
 0xa79   :  { %v1695_v42 = vmul.f32 0.5, %v1694_v1 }
 0xa7b   :  { %1698 = vperm.xlu0 %2256, %v1695_v42  }
 0xafa   :  { %v1699_v35 = vpop.permute.xlu0 %1698 }
 0xafb   :  { %v1701_v59 = vmul.f32 %v1699_v35, %v1522_v22  ;;  %v1702_v45 = vmul.f32 %v1699_v35, %v1524_v41 }
 0xafd   :  { %v1706_v25 = vadd.f32 %v1764_v26, %v1701_v59  ;;  %v1707_v7 = vadd.f32 %v1765_v39, %v1702_v45 }
 0xaff   :  { %v1708_v8 = vand.u32 2147483647, %v1706_v25  ;;  %v1709_v40 = vand.u32 2147483647, %v1707_v7  ;;  %vm1718_vm7 = vcmp.ge.f32.partialorder %v1706_v25, 0.0  ;;  %vm1719_vm8 = vcmp.ge.f32.partialorder %v1707_v7, 0.0 }
 0xb01   :  { %v1710_v53 = vsub.f32 0.0, %v1708_v8  ;;  %v1711_v43 = vsub.f32 0.0, %v1709_v40 }
 0xb03   :  { %v1712_v34 = vmul.f32 1.442695, %v1710_v53  ;;  %v1714_v54 = vmul.f32 1.442695, %v1711_v43 }
 0xb05   :  { %2293 = vpow2.f32 %v1712_v34 }
 0xb06   :  { %2295 = vpow2.f32 %v1714_v54 }
 0xb0f   :  { %v2294_v56 = vpop.eup %2293 }
 0xb10   :  { %v2296_v57 = vpop.eup %2295  ;;  %v1716_v58 = vmul.f32 %v2294_v56, %v2294_v56  ;;  %v1720_v60 = vmul.f32 2.0, %v2294_v56 }
 0xb11   :  { %v1717_v62 = vmul.f32 %v2296_v57, %v2296_v57  ;;  %v1721_v29 = vmul.f32 2.0, %v2296_v57 }
 0xb12   :  { %v1722_v0 = vadd.f32 1.0, %v1720_v60  ;;  %v1724_v3 = vadd.f32 %v1720_v60, %v1716_v58  ;;  %v1728_v4 = vmul.f32 2.0, %v1716_v58 }
 0xb13   :  { %v1723_v17 = vadd.f32 1.0, %v1721_v29  ;;  %v1725_v18 = vadd.f32 %v1721_v29, %v1717_v62  ;;  %v1729_v48 = vmul.f32 2.0, %v1717_v62 }
 0xb14   :  { %v1726_v23 = vsel %vm1718_vm7, %v1722_v0, %v1724_v3  ;;  %v1730_v28 = vsel %vm1718_vm7, %v1728_v4, 2.0 }
 0xb15   :  { %v1727_v27 = vsel %vm1719_vm8, %v1723_v17, %v1725_v18  ;;  %v1731_v61 = vsel %vm1719_vm8, %v1729_v48, 2.0  ;;  %v1732_v37 = vadd.f32 %v1730_v28, %v1726_v23  ;;  %v1742_v46 = vmul.f32 %v1726_v23, %v1706_v25 }
 0xb16   :  { %v1733_v5 = vadd.f32 %v1731_v61, %v1727_v27  ;;  %v1743_v9 = vmul.f32 %v1727_v27, %v1707_v7 }
 0xb17   :  { %2297 = vrcp.f32 %v1732_v37 }
 0xb18   :  { %2299 = vrcp.f32 %v1733_v5 }
 0xb21   :  { %v2298_v21 = vpop.eup %2297 }
 0xb22   :  { %v2300_v22 = vpop.eup %2299  ;;  %v1736_v33 = vmul.f32 %v2298_v21, %v1732_v37 }
 0xb23   :  { %v1737_v41 = vmul.f32 %v2300_v22, %v1733_v5 }
 0xb24   :  { %v1738_v38 = vsub.f32 2.0, %v1736_v33 }
 0xb25   :  { %v1739_v51 = vsub.f32 2.0, %v1737_v41 }
 0xb26   :  { %v1740_v52 = vmul.f32 %v2298_v21, %v1738_v38 }
 0xb27   :  { %v1741_v6 = vmul.f32 %v2300_v22, %v1739_v51 }
 0xb28   :  { %v1744_v11 = vmul.f32 %v1742_v46, %v1740_v52 }
 0xb29   :  { %v1745_v63 = vmul.f32 %v1743_v9, %v1741_v6 }
 0xb2a   :  { %1766 = vst [vmem:[%s2972_s8 + $0x10] sm:$0xff] %v1744_v11 }
 0xb2b   :  { %1767 = vst [vmem:[%s2972_s8 + $0x18] sm:$0xff] %v1745_v63 }

</bundles_post_ra>
